<compile_context>
chip_gen: v5e
topology: v5e:2x2
jax: 0.10.0
libtpu: 0.0.40
codegen_flags: <defaults>
</compile_context>

<pallas_src>
import functools

import jax
import jax.numpy as jnp
from jax import lax
from jax.experimental import pallas as pl
from jax.experimental.pallas import tpu as pltpu

_GATE = 128  # lane-padded per-gate block width (one vreg worth of lanes)


def _row_offsets(input_size, hidden_dim):
    """Static row offsets of the packed weight slab."""
    r_hh = ((input_size + 7) // 8) * 8          # whh starts on a sublane-tile boundary
    r_w1 = r_hh + hidden_dim                    # head layer 1
    r_w2 = r_w1 + hidden_dim                    # head layer 2 (block matrix)
    n_rows = r_w2 + 2 * _GATE
    return r_hh, r_w1, r_w2, n_rows


def _reca2c_kernel(x_ref, w_ref, b_ref, out_ref, *, H, A, r_hh, r_w1, r_w2):
    """x:(L,I), W slab:(n_rows,3G), B slab:(8,3G) -> out:(1,128)."""
    L, I = x_ref.shape
    G = _GATE

    wih = w_ref[0:I, :]                  # (I, 3G)   input->hidden, gates [r|z|n] @ lane 0/128/256
    whh = w_ref[r_hh:r_hh + H, :]        # (H, 3G)   hidden->hidden
    bx = b_ref[0:1, :]                   # (1, 3G)   [b_ir+b_hr | b_iz+b_hz | b_in], gate-padded
    bhn = b_ref[1:2, 0:H]                # (1, H)    b_hn (stays inside r * (...))

    # All input projections at once: removes 3*L M=1 matmuls from the chain.
    gates_x = jnp.dot(x_ref[...], wih, preferred_element_type=jnp.float32) + bx  # (L, 3G)

    h = jnp.zeros((1, H), jnp.float32)
    # L is a static Python int -> fully unrolled, static vreg-aligned slices.
    # (For much larger L, switch to lax.fori_loop(..., unroll=k).)
    for t in range(L):
        gx = gates_x[t:t + 1, :]                                        # (1, 3G)
        hh = jnp.dot(h, whh, preferred_element_type=jnp.float32)        # (1, 3G)
        # Gate slices at lane offsets 0 / 128 / 256 -> all vreg-aligned.
        r = jax.nn.sigmoid(gx[:, 0:H] + hh[:, 0:H])
        z = jax.nn.sigmoid(gx[:, G:G + H] + hh[:, G:G + H])
        n = jnp.tanh(gx[:, 2 * G:2 * G + H] + r * (hh[:, 2 * G:2 * G + H] + bhn))
        h = (1.0 - z) * n + z * h

    # Fused heads: (1,H)@(H,2G) + ReLU, then (1,2G)@(2G,G) block matrix.
    w1 = w_ref[r_w1:r_w1 + H, 0:2 * G]   # cols [0,H)=value head, [G,G+H)=policy head
    b1 = b_ref[2:3, 0:2 * G]
    w2 = w_ref[r_w2:r_w2 + 2 * G, 0:G]   # -> lanes [0,A)=logits, lane A=value, rest 0
    b2 = b_ref[3:4, 0:G]

    h1 = jnp.maximum(jnp.dot(h, w1, preferred_element_type=jnp.float32) + b1, 0.0)
    out = jnp.dot(h1, w2, preferred_element_type=jnp.float32) + b2      # (1, G)

    # Exact masked softmax over the logit lanes; value (lane A) passes through.
    lane = lax.broadcasted_iota(jnp.int32, (1, G), 1)
    is_logit = lane < A
    m = jnp.max(jnp.where(is_logit, out, jnp.float32(-1e30)), axis=-1, keepdims=True)
    e = jnp.where(is_logit, jnp.exp(out - m), 0.0)
    denom = jnp.sum(e, axis=-1, keepdims=True)
    # Single lane-dense store: [softmax(policy) | value | 0 pad].
    out_ref[...] = jnp.where(is_logit, e / denom, out)


def prepare_params(params, input_size, hidden_dim, num_actions):
    """One-time packing of all module parameters into (W slab, B slab).

    Run once per parameter set (hoisted out of the per-call forward path).
    """
    (wih, whh, bih, bhh, wlv, blv, wv, bv, wlp, blp, wp, bp) = params
    H, A, G = hidden_dim, num_actions, _GATE
    assert H % 8 == 0 and H <= G, "hidden_dim must be a multiple of 8 and <= 128"
    assert A + 1 <= G, "num_actions + 1 must fit in one 128-lane block"
    r_hh, r_w1, r_w2, n_rows = _row_offsets(input_size, H)

    def pad_gates(w):  # (rows, 3H) -> (rows, 3G) with gate g at lanes [g*G, g*G+H)
        rows = w.shape[0]
        out = jnp.zeros((rows, 3 * G), jnp.float32)
        for g in range(3):
            out = out.at[:, g * G:g * G + H].set(w[:, g * H:(g + 1) * H])
        return out

    W = jnp.zeros((n_rows, 3 * G), jnp.float32)
    W = W.at[0:input_size, :].set(pad_gates(wih))
    W = W.at[r_hh:r_hh + H, :].set(pad_gates(whh))
    W = W.at[r_w1:r_w1 + H, 0:H].set(wlv)                  # value-head layer 1
    W = W.at[r_w1:r_w1 + H, G:G + H].set(wlp)              # policy-head layer 1
    W = W.at[r_w2:r_w2 + H, A:A + 1].set(wv)               # hv -> value (lane A)
    W = W.at[r_w2 + G:r_w2 + G + H, 0:A].set(wp)           # hp -> logits (lanes 0..A-1)

    # Pre-sum r/z hidden biases into the input-projection bias; b_hn kept
    # separate because it multiplies r inside the new-gate term.
    bx3h = jnp.concatenate([bih[:, :2 * H] + bhh[:, :2 * H], bih[:, 2 * H:]], axis=-1)
    B = jnp.zeros((8, 3 * G), jnp.float32)
    B = B.at[0:1, :].set(pad_gates(bx3h))                  # row 0: fused input bias
    B = B.at[1:2, 0:H].set(bhh[:, 2 * H:])                 # row 1: b_hn
    B = B.at[2:3, 0:H].set(blv)                            # row 2: head layer-1 biases
    B = B.at[2:3, G:G + H].set(blp)
    B = B.at[3:4, 0:A].set(bp)                             # row 3: [b_policy | b_value]
    B = B.at[3:4, A:A + 1].set(bv)
    return W, B


@functools.partial(jax.jit, static_argnames=("hidden_dim", "num_actions"))
def reca2c_forward(x, w_slab, b_slab, *, hidden_dim, num_actions):
    """x: (L, input_size) f32, pre-packed slabs.  Returns (policy (A,), value (1,))."""
    H, A = hidden_dim, num_actions
    L, I = x.shape
    r_hh, r_w1, r_w2, _ = _row_offsets(I, H)

    kernel = functools.partial(_reca2c_kernel, H=H, A=A,
                               r_hh=r_hh, r_w1=r_w1, r_w2=r_w2)
    # No grid: the whole working set (~0.5 MB) lives in VMEM as full-array
    # blocks on every TPU generation; tiling would only add pipeline overhead.
    out = pl.pallas_call(
        kernel,
        out_shape=jax.ShapeDtypeStruct((1, _GATE), jnp.float32),
    )(x, w_slab, b_slab)

    return out[0, :A], out[0, A:A + 1]


def init_params(key, input_size, hidden_dim, num_actions):
    """Deterministic init mirroring PyTorch's uniform(-1/sqrt(H), 1/sqrt(H)).

    GRU weights stored transposed ((in, out)) and gate-concatenated [r|z|n];
    head weights stored transposed.
    """
    ks = jax.random.split(key, 12)
    bound = 1.0 / jnp.sqrt(jnp.float32(hidden_dim))

    def u(k, shape):
        return jax.random.uniform(k, shape, jnp.float32, -bound, bound)

    wih = u(ks[0], (input_size, 3 * hidden_dim))
    whh = u(ks[1], (hidden_dim, 3 * hidden_dim))
    bih = u(ks[2], (1, 3 * hidden_dim))
    bhh = u(ks[3], (1, 3 * hidden_dim))
    wlv = u(ks[4], (hidden_dim, hidden_dim))
    blv = u(ks[5], (1, hidden_dim))
    wv = u(ks[6], (hidden_dim, 1))
    bv = u(ks[7], (1, 1))
    wlp = u(ks[8], (hidden_dim, hidden_dim))
    blp = u(ks[9], (1, hidden_dim))
    wp = u(ks[10], (hidden_dim, num_actions))
    bp = u(ks[11], (1, num_actions))
    return (wih, whh, bih, bhh, wlv, blv, wv, bv, wlp, blp, wp, bp)


def reca2c_reference(x, params):
    """Pure-JAX reference of the PyTorch forward (full-f32 matmul precision)."""
    (wih, whh, bih, bhh, wlv, blv, wv, bv, wlp, blp, wp, bp) = params
    H = whh.shape[0]
    mm = functools.partial(jnp.dot, precision=lax.Precision.HIGHEST)

    def step(h, x_t):
        x_t = x_t[None, :]
        gx = mm(x_t, wih) + bih
        gh = mm(h, whh) + bhh
        r = jax.nn.sigmoid(gx[:, :H] + gh[:, :H])
        z = jax.nn.sigmoid(gx[:, H:2 * H] + gh[:, H:2 * H])
        n = jnp.tanh(gx[:, 2 * H:] + r * gh[:, 2 * H:])
        return (1.0 - z) * n + z * h, None

    h_last, _ = lax.scan(step, jnp.zeros((1, H), jnp.float32), x)
    value = mm(jnp.maximum(mm(h_last, wlv) + blv, 0.0), wv) + bv
    logits = mm(jnp.maximum(mm(h_last, wlp) + blp, 0.0), wp) + bp
    policy = jax.nn.softmax(logits, axis=-1)
    return policy[0], value[0]


if __name__ == "__main__":
    L, input_size, hidden_dim, num_actions = 8, 4, 32, 4

    key = jax.random.PRNGKey(0)
    k_params, k_x = jax.random.split(key)
    params = init_params(k_params, input_size, hidden_dim, num_actions)
    x = jax.random.normal(k_x, (L, input_size), dtype=jnp.float32)

    # One-time parameter packing (hoisted out of the per-call forward path).
    w_slab, b_slab = jax.block_until_ready(
        prepare_params(params, input_size, hidden_dim, num_actions))

    policy, value = reca2c_forward(x, w_slab, b_slab,
                                   hidden_dim=hidden_dim, num_actions=num_actions)
    jax.block_until_ready((policy, value))

    policy_ref, value_ref = reca2c_reference(x, params)
    assert policy.shape == (num_actions,) and value.shape == (1,)
    assert jnp.allclose(policy, policy_ref, atol=1e-3, rtol=1e-3), (policy, policy_ref)
    assert jnp.allclose(value, value_ref, atol=1e-3, rtol=1e-3), (value, value_ref)
    assert jnp.allclose(jnp.sum(policy), 1.0, atol=1e-4)

    print("KERNEL_OK")
</pallas_src>

<mosaic_0001>
module attributes {stable_mosaic.version = 11 : i64} {
  func.func @_reca2c_kernel(%arg0: memref<8x4xf32, #tpu.memory_space<vmem>>, %arg1: memref<328x384xf32, #tpu.memory_space<vmem>>, %arg2: memref<8x384xf32, #tpu.memory_space<vmem>>, %arg3: memref<1x128xf32, #tpu.memory_space<vmem>>) attributes {dimension_semantics = [], scalar_prefetch = 0 : i64, scratch_operands = 0 : i64, tpu.core_type = #tpu.core_type<tc>} {
    %c0 = arith.constant 0 : index
    %c0_0 = arith.constant 0 : index
    %0 = vector.load %arg1[%c0, %c0_0] : memref<328x384xf32, #tpu.memory_space<vmem>>, vector<4x384xf32>
    %c8 = arith.constant 8 : index
    %c0_1 = arith.constant 0 : index
    %1 = vector.load %arg1[%c8, %c0_1] : memref<328x384xf32, #tpu.memory_space<vmem>>, vector<32x384xf32>
    %c0_2 = arith.constant 0 : index
    %c0_3 = arith.constant 0 : index
    %2 = vector.load %arg2[%c0_2, %c0_3] : memref<8x384xf32, #tpu.memory_space<vmem>>, vector<1x384xf32>
    %c1 = arith.constant 1 : index
    %c0_4 = arith.constant 0 : index
    %3 = vector.load %arg2[%c1, %c0_4] : memref<8x384xf32, #tpu.memory_space<vmem>>, vector<1x32xf32>
    %c0_5 = arith.constant 0 : index
    %c0_6 = arith.constant 0 : index
    %4 = vector.load %arg0[%c0_5, %c0_6] : memref<8x4xf32, #tpu.memory_space<vmem>>, vector<8x4xf32>
    %cst = arith.constant dense<0.000000e+00> : vector<8x384xf32>
    %5 = tpu.matmul %4, %0, %cst {dimension_numbers = #tpu.dot_dimension_numbers<[1], [0], [0], [1], [0, 0, 1, 1], [], []>} : vector<8x4xf32>, vector<4x384xf32>, vector<8x384xf32> -> vector<8x384xf32>
    %6 = vector.broadcast %2 : vector<1x384xf32> to vector<8x384xf32>
    %7 = arith.addf %5, %6 : vector<8x384xf32>
    %cst_7 = arith.constant 0.000000e+00 : f32
    %8 = vector.broadcast %cst_7 : f32 to vector<1x32xf32>
    %9 = vector.extract_strided_slice %7 {offsets = [0, 0], sizes = [1, 384], strides = [1, 1]} : vector<8x384xf32> to vector<1x384xf32>
    %cst_8 = arith.constant dense<0.000000e+00> : vector<1x384xf32>
    %10 = tpu.matmul %8, %1, %cst_8 {dimension_numbers = #tpu.dot_dimension_numbers<[1], [0], [0], [1], [0, 0, 1, 1], [], []>} : vector<1x32xf32>, vector<32x384xf32>, vector<1x384xf32> -> vector<1x384xf32>
    %11 = vector.extract_strided_slice %9 {offsets = [0, 0], sizes = [1, 32], strides = [1, 1]} : vector<1x384xf32> to vector<1x32xf32>
    %12 = vector.extract_strided_slice %10 {offsets = [0, 0], sizes = [1, 32], strides = [1, 1]} : vector<1x384xf32> to vector<1x32xf32>
    %13 = arith.addf %11, %12 : vector<1x32xf32>
    %14 = arith.negf %13 : vector<1x32xf32>
    %15 = math.exp %14 : vector<1x32xf32>
    %cst_9 = arith.constant 1.000000e+00 : f32
    %16 = vector.broadcast %cst_9 : f32 to vector<1x32xf32>
    %17 = arith.addf %16, %15 : vector<1x32xf32>
    %18 = arith.divf %16, %17 : vector<1x32xf32>
    %19 = vector.extract_strided_slice %9 {offsets = [0, 128], sizes = [1, 32], strides = [1, 1]} : vector<1x384xf32> to vector<1x32xf32>
    %20 = vector.extract_strided_slice %10 {offsets = [0, 128], sizes = [1, 32], strides = [1, 1]} : vector<1x384xf32> to vector<1x32xf32>
    %21 = arith.addf %19, %20 : vector<1x32xf32>
    %22 = arith.negf %21 : vector<1x32xf32>
    %23 = math.exp %22 : vector<1x32xf32>
    %cst_10 = arith.constant 1.000000e+00 : f32
    %24 = vector.broadcast %cst_10 : f32 to vector<1x32xf32>
    %25 = arith.addf %24, %23 : vector<1x32xf32>
    %26 = arith.divf %24, %25 : vector<1x32xf32>
    %27 = vector.extract_strided_slice %9 {offsets = [0, 256], sizes = [1, 32], strides = [1, 1]} : vector<1x384xf32> to vector<1x32xf32>
    %28 = vector.extract_strided_slice %10 {offsets = [0, 256], sizes = [1, 32], strides = [1, 1]} : vector<1x384xf32> to vector<1x32xf32>
    %29 = arith.addf %28, %3 : vector<1x32xf32>
    %30 = arith.mulf %18, %29 : vector<1x32xf32>
    %31 = arith.addf %27, %30 : vector<1x32xf32>
    %32 = math.tanh %31 : vector<1x32xf32>
    %cst_11 = arith.constant 1.000000e+00 : f32
    %33 = vector.broadcast %cst_11 : f32 to vector<1x32xf32>
    %34 = arith.subf %33, %26 : vector<1x32xf32>
    %35 = arith.mulf %34, %32 : vector<1x32xf32>
    %36 = arith.mulf %26, %8 : vector<1x32xf32>
    %37 = arith.addf %35, %36 : vector<1x32xf32>
    %38 = vector.extract_strided_slice %7 {offsets = [1, 0], sizes = [1, 384], strides = [1, 1]} : vector<8x384xf32> to vector<1x384xf32>
    %cst_12 = arith.constant dense<0.000000e+00> : vector<1x384xf32>
    %39 = tpu.matmul %37, %1, %cst_12 {dimension_numbers = #tpu.dot_dimension_numbers<[1], [0], [0], [1], [0, 0, 1, 1], [], []>} : vector<1x32xf32>, vector<32x384xf32>, vector<1x384xf32> -> vector<1x384xf32>
    %40 = vector.extract_strided_slice %38 {offsets = [0, 0], sizes = [1, 32], strides = [1, 1]} : vector<1x384xf32> to vector<1x32xf32>
    %41 = vector.extract_strided_slice %39 {offsets = [0, 0], sizes = [1, 32], strides = [1, 1]} : vector<1x384xf32> to vector<1x32xf32>
    %42 = arith.addf %40, %41 : vector<1x32xf32>
    %43 = arith.negf %42 : vector<1x32xf32>
    %44 = math.exp %43 : vector<1x32xf32>
    %cst_13 = arith.constant 1.000000e+00 : f32
    %45 = vector.broadcast %cst_13 : f32 to vector<1x32xf32>
    %46 = arith.addf %45, %44 : vector<1x32xf32>
    %47 = arith.divf %45, %46 : vector<1x32xf32>
    %48 = vector.extract_strided_slice %38 {offsets = [0, 128], sizes = [1, 32], strides = [1, 1]} : vector<1x384xf32> to vector<1x32xf32>
    %49 = vector.extract_strided_slice %39 {offsets = [0, 128], sizes = [1, 32], strides = [1, 1]} : vector<1x384xf32> to vector<1x32xf32>
    %50 = arith.addf %48, %49 : vector<1x32xf32>
    %51 = arith.negf %50 : vector<1x32xf32>
    %52 = math.exp %51 : vector<1x32xf32>
    %cst_14 = arith.constant 1.000000e+00 : f32
    %53 = vector.broadcast %cst_14 : f32 to vector<1x32xf32>
    %54 = arith.addf %53, %52 : vector<1x32xf32>
    %55 = arith.divf %53, %54 : vector<1x32xf32>
    %56 = vector.extract_strided_slice %38 {offsets = [0, 256], sizes = [1, 32], strides = [1, 1]} : vector<1x384xf32> to vector<1x32xf32>
    %57 = vector.extract_strided_slice %39 {offsets = [0, 256], sizes = [1, 32], strides = [1, 1]} : vector<1x384xf32> to vector<1x32xf32>
    %58 = arith.addf %57, %3 : vector<1x32xf32>
    %59 = arith.mulf %47, %58 : vector<1x32xf32>
    %60 = arith.addf %56, %59 : vector<1x32xf32>
    %61 = math.tanh %60 : vector<1x32xf32>
    %cst_15 = arith.constant 1.000000e+00 : f32
    %62 = vector.broadcast %cst_15 : f32 to vector<1x32xf32>
    %63 = arith.subf %62, %55 : vector<1x32xf32>
    %64 = arith.mulf %63, %61 : vector<1x32xf32>
    %65 = arith.mulf %55, %37 : vector<1x32xf32>
    %66 = arith.addf %64, %65 : vector<1x32xf32>
    %67 = vector.extract_strided_slice %7 {offsets = [2, 0], sizes = [1, 384], strides = [1, 1]} : vector<8x384xf32> to vector<1x384xf32>
    %cst_16 = arith.constant dense<0.000000e+00> : vector<1x384xf32>
    %68 = tpu.matmul %66, %1, %cst_16 {dimension_numbers = #tpu.dot_dimension_numbers<[1], [0], [0], [1], [0, 0, 1, 1], [], []>} : vector<1x32xf32>, vector<32x384xf32>, vector<1x384xf32> -> vector<1x384xf32>
    %69 = vector.extract_strided_slice %67 {offsets = [0, 0], sizes = [1, 32], strides = [1, 1]} : vector<1x384xf32> to vector<1x32xf32>
    %70 = vector.extract_strided_slice %68 {offsets = [0, 0], sizes = [1, 32], strides = [1, 1]} : vector<1x384xf32> to vector<1x32xf32>
    %71 = arith.addf %69, %70 : vector<1x32xf32>
    %72 = arith.negf %71 : vector<1x32xf32>
    %73 = math.exp %72 : vector<1x32xf32>
    %cst_17 = arith.constant 1.000000e+00 : f32
    %74 = vector.broadcast %cst_17 : f32 to vector<1x32xf32>
    %75 = arith.addf %74, %73 : vector<1x32xf32>
    %76 = arith.divf %74, %75 : vector<1x32xf32>
    %77 = vector.extract_strided_slice %67 {offsets = [0, 128], sizes = [1, 32], strides = [1, 1]} : vector<1x384xf32> to vector<1x32xf32>
    %78 = vector.extract_strided_slice %68 {offsets = [0, 128], sizes = [1, 32], strides = [1, 1]} : vector<1x384xf32> to vector<1x32xf32>
    %79 = arith.addf %77, %78 : vector<1x32xf32>
    %80 = arith.negf %79 : vector<1x32xf32>
    %81 = math.exp %80 : vector<1x32xf32>
    %cst_18 = arith.constant 1.000000e+00 : f32
    %82 = vector.broadcast %cst_18 : f32 to vector<1x32xf32>
    %83 = arith.addf %82, %81 : vector<1x32xf32>
    %84 = arith.divf %82, %83 : vector<1x32xf32>
    %85 = vector.extract_strided_slice %67 {offsets = [0, 256], sizes = [1, 32], strides = [1, 1]} : vector<1x384xf32> to vector<1x32xf32>
    %86 = vector.extract_strided_slice %68 {offsets = [0, 256], sizes = [1, 32], strides = [1, 1]} : vector<1x384xf32> to vector<1x32xf32>
    %87 = arith.addf %86, %3 : vector<1x32xf32>
    %88 = arith.mulf %76, %87 : vector<1x32xf32>
    %89 = arith.addf %85, %88 : vector<1x32xf32>
    %90 = math.tanh %89 : vector<1x32xf32>
    %cst_19 = arith.constant 1.000000e+00 : f32
    %91 = vector.broadcast %cst_19 : f32 to vector<1x32xf32>
    %92 = arith.subf %91, %84 : vector<1x32xf32>
    %93 = arith.mulf %92, %90 : vector<1x32xf32>
    %94 = arith.mulf %84, %66 : vector<1x32xf32>
    %95 = arith.addf %93, %94 : vector<1x32xf32>
    %96 = vector.extract_strided_slice %7 {offsets = [3, 0], sizes = [1, 384], strides = [1, 1]} : vector<8x384xf32> to vector<1x384xf32>
    %cst_20 = arith.constant dense<0.000000e+00> : vector<1x384xf32>
    %97 = tpu.matmul %95, %1, %cst_20 {dimension_numbers = #tpu.dot_dimension_numbers<[1], [0], [0], [1], [0, 0, 1, 1], [], []>} : vector<1x32xf32>, vector<32x384xf32>, vector<1x384xf32> -> vector<1x384xf32>
    %98 = vector.extract_strided_slice %96 {offsets = [0, 0], sizes = [1, 32], strides = [1, 1]} : vector<1x384xf32> to vector<1x32xf32>
    %99 = vector.extract_strided_slice %97 {offsets = [0, 0], sizes = [1, 32], strides = [1, 1]} : vector<1x384xf32> to vector<1x32xf32>
    %100 = arith.addf %98, %99 : vector<1x32xf32>
    %101 = arith.negf %100 : vector<1x32xf32>
    %102 = math.exp %101 : vector<1x32xf32>
    %cst_21 = arith.constant 1.000000e+00 : f32
    %103 = vector.broadcast %cst_21 : f32 to vector<1x32xf32>
    %104 = arith.addf %103, %102 : vector<1x32xf32>
    %105 = arith.divf %103, %104 : vector<1x32xf32>
    %106 = vector.extract_strided_slice %96 {offsets = [0, 128], sizes = [1, 32], strides = [1, 1]} : vector<1x384xf32> to vector<1x32xf32>
    %107 = vector.extract_strided_slice %97 {offsets = [0, 128], sizes = [1, 32], strides = [1, 1]} : vector<1x384xf32> to vector<1x32xf32>
    %108 = arith.addf %106, %107 : vector<1x32xf32>
    %109 = arith.negf %108 : vector<1x32xf32>
    %110 = math.exp %109 : vector<1x32xf32>
    %cst_22 = arith.constant 1.000000e+00 : f32
    %111 = vector.broadcast %cst_22 : f32 to vector<1x32xf32>
    %112 = arith.addf %111, %110 : vector<1x32xf32>
    %113 = arith.divf %111, %112 : vector<1x32xf32>
    %114 = vector.extract_strided_slice %96 {offsets = [0, 256], sizes = [1, 32], strides = [1, 1]} : vector<1x384xf32> to vector<1x32xf32>
    %115 = vector.extract_strided_slice %97 {offsets = [0, 256], sizes = [1, 32], strides = [1, 1]} : vector<1x384xf32> to vector<1x32xf32>
    %116 = arith.addf %115, %3 : vector<1x32xf32>
    %117 = arith.mulf %105, %116 : vector<1x32xf32>
    %118 = arith.addf %114, %117 : vector<1x32xf32>
    %119 = math.tanh %118 : vector<1x32xf32>
    %cst_23 = arith.constant 1.000000e+00 : f32
    %120 = vector.broadcast %cst_23 : f32 to vector<1x32xf32>
    %121 = arith.subf %120, %113 : vector<1x32xf32>
    %122 = arith.mulf %121, %119 : vector<1x32xf32>
    %123 = arith.mulf %113, %95 : vector<1x32xf32>
    %124 = arith.addf %122, %123 : vector<1x32xf32>
    %125 = vector.extract_strided_slice %7 {offsets = [4, 0], sizes = [1, 384], strides = [1, 1]} : vector<8x384xf32> to vector<1x384xf32>
    %cst_24 = arith.constant dense<0.000000e+00> : vector<1x384xf32>
    %126 = tpu.matmul %124, %1, %cst_24 {dimension_numbers = #tpu.dot_dimension_numbers<[1], [0], [0], [1], [0, 0, 1, 1], [], []>} : vector<1x32xf32>, vector<32x384xf32>, vector<1x384xf32> -> vector<1x384xf32>
    %127 = vector.extract_strided_slice %125 {offsets = [0, 0], sizes = [1, 32], strides = [1, 1]} : vector<1x384xf32> to vector<1x32xf32>
    %128 = vector.extract_strided_slice %126 {offsets = [0, 0], sizes = [1, 32], strides = [1, 1]} : vector<1x384xf32> to vector<1x32xf32>
    %129 = arith.addf %127, %128 : vector<1x32xf32>
    %130 = arith.negf %129 : vector<1x32xf32>
    %131 = math.exp %130 : vector<1x32xf32>
    %cst_25 = arith.constant 1.000000e+00 : f32
    %132 = vector.broadcast %cst_25 : f32 to vector<1x32xf32>
    %133 = arith.addf %132, %131 : vector<1x32xf32>
    %134 = arith.divf %132, %133 : vector<1x32xf32>
    %135 = vector.extract_strided_slice %125 {offsets = [0, 128], sizes = [1, 32], strides = [1, 1]} : vector<1x384xf32> to vector<1x32xf32>
    %136 = vector.extract_strided_slice %126 {offsets = [0, 128], sizes = [1, 32], strides = [1, 1]} : vector<1x384xf32> to vector<1x32xf32>
    %137 = arith.addf %135, %136 : vector<1x32xf32>
    %138 = arith.negf %137 : vector<1x32xf32>
    %139 = math.exp %138 : vector<1x32xf32>
    %cst_26 = arith.constant 1.000000e+00 : f32
    %140 = vector.broadcast %cst_26 : f32 to vector<1x32xf32>
    %141 = arith.addf %140, %139 : vector<1x32xf32>
    %142 = arith.divf %140, %141 : vector<1x32xf32>
    %143 = vector.extract_strided_slice %125 {offsets = [0, 256], sizes = [1, 32], strides = [1, 1]} : vector<1x384xf32> to vector<1x32xf32>
    %144 = vector.extract_strided_slice %126 {offsets = [0, 256], sizes = [1, 32], strides = [1, 1]} : vector<1x384xf32> to vector<1x32xf32>
    %145 = arith.addf %144, %3 : vector<1x32xf32>
    %146 = arith.mulf %134, %145 : vector<1x32xf32>
    %147 = arith.addf %143, %146 : vector<1x32xf32>
    %148 = math.tanh %147 : vector<1x32xf32>
    %cst_27 = arith.constant 1.000000e+00 : f32
    %149 = vector.broadcast %cst_27 : f32 to vector<1x32xf32>
    %150 = arith.subf %149, %142 : vector<1x32xf32>
    %151 = arith.mulf %150, %148 : vector<1x32xf32>
    %152 = arith.mulf %142, %124 : vector<1x32xf32>
    %153 = arith.addf %151, %152 : vector<1x32xf32>
    %154 = vector.extract_strided_slice %7 {offsets = [5, 0], sizes = [1, 384], strides = [1, 1]} : vector<8x384xf32> to vector<1x384xf32>
    %cst_28 = arith.constant dense<0.000000e+00> : vector<1x384xf32>
    %155 = tpu.matmul %153, %1, %cst_28 {dimension_numbers = #tpu.dot_dimension_numbers<[1], [0], [0], [1], [0, 0, 1, 1], [], []>} : vector<1x32xf32>, vector<32x384xf32>, vector<1x384xf32> -> vector<1x384xf32>
    %156 = vector.extract_strided_slice %154 {offsets = [0, 0], sizes = [1, 32], strides = [1, 1]} : vector<1x384xf32> to vector<1x32xf32>
    %157 = vector.extract_strided_slice %155 {offsets = [0, 0], sizes = [1, 32], strides = [1, 1]} : vector<1x384xf32> to vector<1x32xf32>
    %158 = arith.addf %156, %157 : vector<1x32xf32>
    %159 = arith.negf %158 : vector<1x32xf32>
    %160 = math.exp %159 : vector<1x32xf32>
    %cst_29 = arith.constant 1.000000e+00 : f32
    %161 = vector.broadcast %cst_29 : f32 to vector<1x32xf32>
    %162 = arith.addf %161, %160 : vector<1x32xf32>
    %163 = arith.divf %161, %162 : vector<1x32xf32>
    %164 = vector.extract_strided_slice %154 {offsets = [0, 128], sizes = [1, 32], strides = [1, 1]} : vector<1x384xf32> to vector<1x32xf32>
    %165 = vector.extract_strided_slice %155 {offsets = [0, 128], sizes = [1, 32], strides = [1, 1]} : vector<1x384xf32> to vector<1x32xf32>
    %166 = arith.addf %164, %165 : vector<1x32xf32>
    %167 = arith.negf %166 : vector<1x32xf32>
    %168 = math.exp %167 : vector<1x32xf32>
    %cst_30 = arith.constant 1.000000e+00 : f32
    %169 = vector.broadcast %cst_30 : f32 to vector<1x32xf32>
    %170 = arith.addf %169, %168 : vector<1x32xf32>
    %171 = arith.divf %169, %170 : vector<1x32xf32>
    %172 = vector.extract_strided_slice %154 {offsets = [0, 256], sizes = [1, 32], strides = [1, 1]} : vector<1x384xf32> to vector<1x32xf32>
    %173 = vector.extract_strided_slice %155 {offsets = [0, 256], sizes = [1, 32], strides = [1, 1]} : vector<1x384xf32> to vector<1x32xf32>
    %174 = arith.addf %173, %3 : vector<1x32xf32>
    %175 = arith.mulf %163, %174 : vector<1x32xf32>
    %176 = arith.addf %172, %175 : vector<1x32xf32>
    %177 = math.tanh %176 : vector<1x32xf32>
    %cst_31 = arith.constant 1.000000e+00 : f32
    %178 = vector.broadcast %cst_31 : f32 to vector<1x32xf32>
    %179 = arith.subf %178, %171 : vector<1x32xf32>
    %180 = arith.mulf %179, %177 : vector<1x32xf32>
    %181 = arith.mulf %171, %153 : vector<1x32xf32>
    %182 = arith.addf %180, %181 : vector<1x32xf32>
    %183 = vector.extract_strided_slice %7 {offsets = [6, 0], sizes = [1, 384], strides = [1, 1]} : vector<8x384xf32> to vector<1x384xf32>
    %cst_32 = arith.constant dense<0.000000e+00> : vector<1x384xf32>
    %184 = tpu.matmul %182, %1, %cst_32 {dimension_numbers = #tpu.dot_dimension_numbers<[1], [0], [0], [1], [0, 0, 1, 1], [], []>} : vector<1x32xf32>, vector<32x384xf32>, vector<1x384xf32> -> vector<1x384xf32>
    %185 = vector.extract_strided_slice %183 {offsets = [0, 0], sizes = [1, 32], strides = [1, 1]} : vector<1x384xf32> to vector<1x32xf32>
    %186 = vector.extract_strided_slice %184 {offsets = [0, 0], sizes = [1, 32], strides = [1, 1]} : vector<1x384xf32> to vector<1x32xf32>
    %187 = arith.addf %185, %186 : vector<1x32xf32>
    %188 = arith.negf %187 : vector<1x32xf32>
    %189 = math.exp %188 : vector<1x32xf32>
    %cst_33 = arith.constant 1.000000e+00 : f32
    %190 = vector.broadcast %cst_33 : f32 to vector<1x32xf32>
    %191 = arith.addf %190, %189 : vector<1x32xf32>
    %192 = arith.divf %190, %191 : vector<1x32xf32>
    %193 = vector.extract_strided_slice %183 {offsets = [0, 128], sizes = [1, 32], strides = [1, 1]} : vector<1x384xf32> to vector<1x32xf32>
    %194 = vector.extract_strided_slice %184 {offsets = [0, 128], sizes = [1, 32], strides = [1, 1]} : vector<1x384xf32> to vector<1x32xf32>
    %195 = arith.addf %193, %194 : vector<1x32xf32>
    %196 = arith.negf %195 : vector<1x32xf32>
    %197 = math.exp %196 : vector<1x32xf32>
    %cst_34 = arith.constant 1.000000e+00 : f32
    %198 = vector.broadcast %cst_34 : f32 to vector<1x32xf32>
    %199 = arith.addf %198, %197 : vector<1x32xf32>
    %200 = arith.divf %198, %199 : vector<1x32xf32>
    %201 = vector.extract_strided_slice %183 {offsets = [0, 256], sizes = [1, 32], strides = [1, 1]} : vector<1x384xf32> to vector<1x32xf32>
    %202 = vector.extract_strided_slice %184 {offsets = [0, 256], sizes = [1, 32], strides = [1, 1]} : vector<1x384xf32> to vector<1x32xf32>
    %203 = arith.addf %202, %3 : vector<1x32xf32>
    %204 = arith.mulf %192, %203 : vector<1x32xf32>
    %205 = arith.addf %201, %204 : vector<1x32xf32>
    %206 = math.tanh %205 : vector<1x32xf32>
    %cst_35 = arith.constant 1.000000e+00 : f32
    %207 = vector.broadcast %cst_35 : f32 to vector<1x32xf32>
    %208 = arith.subf %207, %200 : vector<1x32xf32>
    %209 = arith.mulf %208, %206 : vector<1x32xf32>
    %210 = arith.mulf %200, %182 : vector<1x32xf32>
    %211 = arith.addf %209, %210 : vector<1x32xf32>
    %212 = vector.extract_strided_slice %7 {offsets = [7, 0], sizes = [1, 384], strides = [1, 1]} : vector<8x384xf32> to vector<1x384xf32>
    %cst_36 = arith.constant dense<0.000000e+00> : vector<1x384xf32>
    %213 = tpu.matmul %211, %1, %cst_36 {dimension_numbers = #tpu.dot_dimension_numbers<[1], [0], [0], [1], [0, 0, 1, 1], [], []>} : vector<1x32xf32>, vector<32x384xf32>, vector<1x384xf32> -> vector<1x384xf32>
    %214 = vector.extract_strided_slice %212 {offsets = [0, 0], sizes = [1, 32], strides = [1, 1]} : vector<1x384xf32> to vector<1x32xf32>
    %215 = vector.extract_strided_slice %213 {offsets = [0, 0], sizes = [1, 32], strides = [1, 1]} : vector<1x384xf32> to vector<1x32xf32>
    %216 = arith.addf %214, %215 : vector<1x32xf32>
    %217 = arith.negf %216 : vector<1x32xf32>
    %218 = math.exp %217 : vector<1x32xf32>
    %cst_37 = arith.constant 1.000000e+00 : f32
    %219 = vector.broadcast %cst_37 : f32 to vector<1x32xf32>
    %220 = arith.addf %219, %218 : vector<1x32xf32>
    %221 = arith.divf %219, %220 : vector<1x32xf32>
    %222 = vector.extract_strided_slice %212 {offsets = [0, 128], sizes = [1, 32], strides = [1, 1]} : vector<1x384xf32> to vector<1x32xf32>
    %223 = vector.extract_strided_slice %213 {offsets = [0, 128], sizes = [1, 32], strides = [1, 1]} : vector<1x384xf32> to vector<1x32xf32>
    %224 = arith.addf %222, %223 : vector<1x32xf32>
    %225 = arith.negf %224 : vector<1x32xf32>
    %226 = math.exp %225 : vector<1x32xf32>
    %cst_38 = arith.constant 1.000000e+00 : f32
    %227 = vector.broadcast %cst_38 : f32 to vector<1x32xf32>
    %228 = arith.addf %227, %226 : vector<1x32xf32>
    %229 = arith.divf %227, %228 : vector<1x32xf32>
    %230 = vector.extract_strided_slice %212 {offsets = [0, 256], sizes = [1, 32], strides = [1, 1]} : vector<1x384xf32> to vector<1x32xf32>
    %231 = vector.extract_strided_slice %213 {offsets = [0, 256], sizes = [1, 32], strides = [1, 1]} : vector<1x384xf32> to vector<1x32xf32>
    %232 = arith.addf %231, %3 : vector<1x32xf32>
    %233 = arith.mulf %221, %232 : vector<1x32xf32>
    %234 = arith.addf %230, %233 : vector<1x32xf32>
    %235 = math.tanh %234 : vector<1x32xf32>
    %cst_39 = arith.constant 1.000000e+00 : f32
    %236 = vector.broadcast %cst_39 : f32 to vector<1x32xf32>
    %237 = arith.subf %236, %229 : vector<1x32xf32>
    %238 = arith.mulf %237, %235 : vector<1x32xf32>
    %239 = arith.mulf %229, %211 : vector<1x32xf32>
    %240 = arith.addf %238, %239 : vector<1x32xf32>
    %c40 = arith.constant 40 : index
    %c0_40 = arith.constant 0 : index
    %241 = vector.load %arg1[%c40, %c0_40] : memref<328x384xf32, #tpu.memory_space<vmem>>, vector<32x256xf32>
    %c2 = arith.constant 2 : index
    %c0_41 = arith.constant 0 : index
    %242 = vector.load %arg2[%c2, %c0_41] : memref<8x384xf32, #tpu.memory_space<vmem>>, vector<1x256xf32>
    %c72 = arith.constant 72 : index
    %c0_42 = arith.constant 0 : index
    %243 = vector.load %arg1[%c72, %c0_42] : memref<328x384xf32, #tpu.memory_space<vmem>>, vector<256x128xf32>
    %c3 = arith.constant 3 : index
    %c0_43 = arith.constant 0 : index
    %244 = vector.load %arg2[%c3, %c0_43] : memref<8x384xf32, #tpu.memory_space<vmem>>, vector<1x128xf32>
    %cst_44 = arith.constant dense<0.000000e+00> : vector<1x256xf32>
    %245 = tpu.matmul %240, %241, %cst_44 {dimension_numbers = #tpu.dot_dimension_numbers<[1], [0], [0], [1], [0, 0, 1, 1], [], []>} : vector<1x32xf32>, vector<32x256xf32>, vector<1x256xf32> -> vector<1x256xf32>
    %246 = arith.addf %245, %242 : vector<1x256xf32>
    %cst_45 = arith.constant 0.000000e+00 : f32
    %247 = vector.broadcast %cst_45 : f32 to vector<1x256xf32>
    %248 = arith.maximumf %246, %247 : vector<1x256xf32>
    %cst_46 = arith.constant dense<0.000000e+00> : vector<1x128xf32>
    %249 = tpu.matmul %248, %243, %cst_46 {dimension_numbers = #tpu.dot_dimension_numbers<[1], [0], [0], [1], [0, 0, 1, 1], [], []>} : vector<1x256xf32>, vector<256x128xf32>, vector<1x128xf32> -> vector<1x128xf32>
    %250 = arith.addf %249, %244 : vector<1x128xf32>
    %251 = tpu.iota {dimensions = array<i32: 1>} : vector<1x128xi32>
    %c4_i32 = arith.constant 4 : i32
    %252 = vector.broadcast %c4_i32 : i32 to vector<1x128xi32>
    %253 = arith.cmpi slt, %251, %252 : vector<1x128xi32>
    %cst_47 = arith.constant -1.000000e+30 : f32
    %254 = vector.broadcast %cst_47 : f32 to vector<1x128xf32>
    %255 = arith.select %253, %250, %254 : vector<1x128xi1>, vector<1x128xf32>
    %cst_48 = arith.constant dense<0xFF800000> : vector<1xf32>
    %256 = vector.multi_reduction <maximumf>, %255, %cst_48 [1] : vector<1x128xf32> to vector<1xf32>
    %257 = vector.shape_cast %256 : vector<1xf32> to vector<1x1xf32>
    %258 = vector.broadcast %257 : vector<1x1xf32> to vector<1x128xf32>
    %259 = arith.subf %250, %258 : vector<1x128xf32>
    %260 = math.exp %259 : vector<1x128xf32>
    %cst_49 = arith.constant 0.000000e+00 : f32
    %261 = vector.broadcast %cst_49 : f32 to vector<1x128xf32>
    %262 = arith.select %253, %260, %261 : vector<1x128xi1>, vector<1x128xf32>
    %cst_50 = arith.constant dense<0.000000e+00> : vector<1xf32>
    %263 = vector.multi_reduction <add>, %262, %cst_50 [1] : vector<1x128xf32> to vector<1xf32>
    %264 = vector.shape_cast %263 : vector<1xf32> to vector<1x1xf32>
    %265 = vector.broadcast %264 : vector<1x1xf32> to vector<1x128xf32>
    %266 = arith.divf %262, %265 : vector<1x128xf32>
    %267 = arith.select %253, %266, %250 : vector<1x128xi1>, vector<1x128xf32>
    %c0_51 = arith.constant 0 : index
    %c0_52 = arith.constant 0 : index
    %268 = vector.load %arg3[%c0_51, %c0_52] : memref<1x128xf32, #tpu.memory_space<vmem>>, vector<1x128xf32>
    tpu.vector_store %arg3[%c0_51, %c0_52], %267 {strides = array<i32>} : memref<1x128xf32, #tpu.memory_space<vmem>>, vector<1x128xf32>,
    return
  }
}

</mosaic_0001>

<bundles_post_ra>
// kernel: reca2c_forward.1
= control target key start
LH: loop header
LB: loop body
LE: loop exit
PB: predicated region body
PF: predicated region fallthrough
CT: control target
= control target key end

     0   :  { %8 = vsyncpa [#allocation3], 0  ;;  %s1742_s0 = inlined_call_operand.vmem [shape: f32[8,4], index: 0, kind: input, shape index: {}]   ;;  %s1743_s1 = inlined_call_operand.hbm [shape: f32[328,384], index: 1, kind: input, shape index: {}]   ;;  %s1744_s2 = inlined_call_operand.hbm [shape: f32[8,384], index: 2, kind: input, shape index: {}]   ;;  %s1745_s3 = inlined_call_operand.vmem [shape: f32[1,128], index: 3, kind: output, shape index: {}]  }
   0x1   :  { %s16_s14 = sshll.u32 %s1743_s1, 4  ;;  %s17_s14 = int_to_ptr.hbm [resolvable:$true] %s16_s14 }
   0x2   :  { %9 = vsyncpa [#allocation5], 0  ;;  %s1474_s15 = smov [#allocation2]   ;;  %s30_s19 = sshll.u32 %s1744_s2, 4  ;;  %s31_s19 = int_to_ptr.hbm [resolvable:$true] %s30_s19 }
   0x3   :  { %s18_s16 = sshll.u32 %s1474_s15, 4  ;;  %s1475_s20 = smov 384   ;;  %s19_s16 = int_to_ptr.vmem [resolvable:$true] %s18_s16 }
   0x4   :  { %s1476_s21 = smov 24   ;;  %s1477_s22 = smov [#allocation4]  }
   0x5   :  { %24 = dma.hbm_to_vmem [thread:$0]  %s17_s14, 15744, %s19_s16, [#allocation3], %s1475_s20, %s1475_s20, %s1476_s21  }
   0x6   :  { %s32_s23 = sshll.u32 %s1477_s22, 4  ;;  %s33_s23 = int_to_ptr.vmem [resolvable:$true] %s32_s23 }
   0x7   :  { %35 = dma.hbm_to_vmem [thread:$0]  %s31_s19, 384, %s33_s23, [#allocation5]  }
   0x8   :  { %1470 = dma.done.wait [#allocation3], 15744  }
   0x9   :  { %1471 = vsyncadd [#allocation3], 4294951552 }
   0xa   :  { %1472 = dma.done.wait [#allocation5], 384  }
   0xb   :  { %1473 = vsyncadd [#allocation5], 4294966912  ;;  %vm73_vm0 = vcmask 1043456   ;;  %vm69_vm1 = vcmask 31744   ;;  %v44_v0 = vld [vmem:[#allocation2] sm:$0xf] }
   0xc   :  { %v45_v1 = vld [vmem:[#allocation2 + $0x8] sm:$0xf]  ;;  %v61_v2 = vld [vmem:[%s1742_s0] sm:$0xff]  ;;  %1287 = vmatpush.msk.msra.mxu0 %vm73_vm0, %v44_v0  ;;  %v1518_v6 = vld [vmem:[#allocation2 + $0x50] sm:$0xff]  ;;  %v1478_v13 = vmov 0.0   ;;  %vm143_vm10 = vcmask 261120  }
   0xd   :  { %1289 = vmatpush.msk.msra.mxu3 %vm73_vm0, %v45_v1  ;;  %v1510_v3 = vld [vmem:[#allocation2 + $0x60] sm:$0xff]  ;;  %v1512_v4 = vld [vmem:[#allocation2 + $0x68] sm:$0xff]  ;;  %1288 = vmatmul.msk.f32.vlgmr.msra.gmra.mxu0 %vm69_vm1, %v61_v2  ;;  %v1522_v7 = vld [vmem:[#allocation2 + $0x30] sm:$0xff] }
   0xe   :  { %1290 = vmatmul.msk.f32.vlgmr.msra.gmra.mxu3 %vm69_vm1, %v61_v2  ;;  %v1516_v5 = vld [vmem:[#allocation2 + $0x48] sm:$0xff]  ;;  %179 = vmatpush.msrb.mxu0 %v1512_v4  ;;  %v1524_v8 = vld [vmem:[#allocation2 + $0x38] sm:$0xff]  ;;  %v46_v9 = vld [vmem:[#allocation2 + $0x10] sm:$0xf] }
   0xf   :  { %159 = vmatpush.msrb.mxu3 %v1510_v3  ;;  %393 = vmatpush.msra.mxu1 %v1510_v3  ;;  %v1529_v10 = vld [vmem:[#allocation2 + $0x18] sm:$0xff]  ;;  %v1531_v11 = vld [vmem:[#allocation2 + $0x20] sm:$0xff]  ;;  %v1537_v12 = vld [vmem:[#allocation2 + $0x70] sm:$0xff] }
  0x10   :  { %180 = vmatpush.msrb.mxu0 %v1518_v6  ;;  %1291 = vmatpush.msk.msra.mxu2 %vm73_vm0, %v46_v9  ;;  %v1543_v14 = vld [vmem:[#allocation2 + $0x58] sm:$0xff]  ;;  %v1547_v15 = vld [vmem:[#allocation2 + $0x40] sm:$0xff]  ;;  %v1553_v16 = vld [vmem:[#allocation2 + $0x28] sm:$0xff] }
  0x11   :  { %160 = vmatpush.msrb.mxu3 %v1516_v5  ;;  %394 = vmatpush.msra.mxu1 %v1516_v5  ;;  %v59_v17 = vld [vmem:[#allocation4] ss:$8 sm:$0x7]  ;;  %v1588_v40 = vld [vmem:[#allocation4 + $0x1] ss:$0 sm:$0xff] }
  0x12   :  { %181 = vmatpush.msrb.mxu0 %v1524_v8  ;;  %1292 = vmatmul.msk.f32.vlgmr.msra.gmra.mxu2 %vm69_vm1, %v61_v2  ;;  %v64_v19 = vperm.slane %v59_v17, 1  ;;  %v63_v21 = vperm.slane %v59_v17, 0  ;;  %v65_v45 = vperm.slane %v59_v17, 2 }
  0x13   :  { %161 = vmatpush.msrb.mxu3 %v1522_v7  ;;  %395 = vmatpush.msra.mxu1 %v1522_v7 }
  0x14   :  { %182 = vmatpush.msrb.mxu0 %v1531_v11  ;;  %413 = vmatpush.msrb.mxu2 %v1512_v4 }
  0x15   :  { %162 = vmatpush.msrb.mxu3 %v1529_v10  ;;  %183 = vmatmul.f32.vlgmr.msrb.gmra.mxu0 %v1478_v13 }
  0x16   :  { %163 = vmatmul.f32.vlgmr.msrb.gmra.mxu3 %v1478_v13  ;;  %270 = vmatpush.msra.mxu0 %v1510_v3 }
  0x17   :  { %199 = vmatpush.msra.mxu3 %v1537_v12  ;;  %396 = vmatpush.msra.mxu1 %v1529_v10 }
  0x18   :  { %271 = vmatpush.msra.mxu0 %v1516_v5  ;;  %414 = vmatpush.msrb.mxu2 %v1518_v6 }
  0x19   :  { %200 = vmatpush.msra.mxu3 %v1543_v14  ;;  %536 = vmatpush.msrb.mxu1 %v1512_v4 }
  0x1a   :  { %272 = vmatpush.msra.mxu0 %v1522_v7  ;;  %415 = vmatpush.msrb.mxu2 %v1524_v8 }
  0x1b   :  { %201 = vmatpush.msra.mxu3 %v1547_v15  ;;  %537 = vmatpush.msrb.mxu1 %v1518_v6 }
  0x1c   :  { %273 = vmatpush.msra.mxu0 %v1529_v10  ;;  %416 = vmatpush.msrb.mxu2 %v1531_v11 }
  0x1d   :  { %202 = vmatpush.msra.mxu3 %v1553_v16  ;;  %538 = vmatpush.msrb.mxu1 %v1524_v8 }
  0x1e   :  { %203 = vmatmul.f32.vlgmr.msra.gmra.mxu3 %v1478_v13  ;;  %310 = vmatpush.msrb.mxu0 %v1537_v12 }
  0x1f   :  { %290 = vmatpush.msrb.mxu3 %v1512_v4  ;;  %556 = vmatpush.msra.mxu2 %v1537_v12 }
  0x20   :  { %311 = vmatpush.msrb.mxu0 %v1543_v14  ;;  %539 = vmatpush.msrb.mxu1 %v1531_v11 }
  0x21   :  { %291 = vmatpush.msrb.mxu3 %v1518_v6  ;;  %557 = vmatpush.msra.mxu2 %v1543_v14 }
  0x22   :  { %312 = vmatpush.msrb.mxu0 %v1547_v15 }
  0x23   :  { %292 = vmatpush.msrb.mxu3 %v1524_v8  ;;  %558 = vmatpush.msra.mxu2 %v1547_v15 }
  0x24   :  { %313 = vmatpush.msrb.mxu0 %v1553_v16 }
  0x25   :  { %293 = vmatpush.msrb.mxu3 %v1531_v11  ;;  %559 = vmatpush.msra.mxu2 %v1553_v16 }
  0x27   :  { %433 = vmatpush.msra.mxu3 %v1537_v12 }
  0x29   :  { %434 = vmatpush.msra.mxu3 %v1543_v14 }
  0x2b   :  { %435 = vmatpush.msra.mxu3 %v1547_v15 }
  0x2d   :  { %436 = vmatpush.msra.mxu3 %v1553_v16 }
  0x8a   :  { %v100_v18 = vpop.f32.mrf.mxu0 }
  0x8b   :  { %v1585_v25 = vadd.f32 %v100_v18, %v63_v21 }
  0x91   :  { %v120_v20 = vpop.f32.mrf.mxu3 }
  0x92   :  { %v1582_v22 = vadd.f32 %v120_v20, %v64_v19  ;;  %v184_v23 = vpop.f32.mrf.mxu0 }
  0x94   :  { %v227_v24 = vadd.f32 %v184_v23, %v1582_v22 }
  0x95   :  { %v140_v47 = vpop.f32.mrf.mxu2 }
  0x96   :  { %v1294_v26 = vmul.f32 -1.442695, %v227_v24  ;;  %v1591_v52 = vadd.f32 %v140_v47, %v65_v45 }
  0x98   :  { %1337 = vpow2.f32 %v1294_v26 }
  0x99   :  { %v164_v27 = vpop.f32.mrf.mxu3 }
  0x9a   :  { %v207_v28 = vadd.f32 %v164_v27, %v1585_v25 }
  0x9c   :  { %v1293_v29 = vmul.f32 -1.442695, %v207_v28 }
  0x9e   :  { %v1338_v30 = vpop.eup %1337  ;;  %1339 = vpow2.f32 %v1293_v29 }
  0x9f   :  { %v231_v31 = vadd.f32 1.0, %v1338_v30 }
  0xa1   :  { %1341 = vrcp.f32 %v231_v31  ;;  %v204_v41 = vpop.f32.mrf.mxu3  ;;  %v243_v55 = vand.u32 2147483648, %v231_v31  ;;  %vm237_vm7 = vweird.f32 %v231_v31  ;;  %v241_v57 = vand.u32 2147483647, %v231_v31 }
  0xa2   :  { %v247_v49 = vadd.f32 %v204_v41, %v1588_v40 }
  0xa3   :  { %v244_v60 = vor.u32 1.1754944e-38, %v243_v55  ;;  %vm242_vm9 = vcmp.eq.f32.partialorder %v241_v57, 8.507059e+37 }
  0xa4   :  { %v1340_v32 = vpop.eup %1339 }
  0xa5   :  { %v211_v33 = vadd.f32 1.0, %v1340_v32 }
  0xa7   :  { %1343 = vrcp.f32 %v211_v33  ;;  %v1342_v34 = vpop.eup %1341  ;;  %v223_v42 = vand.u32 2147483648, %v211_v33  ;;  %v221_v44 = vand.u32 2147483647, %v211_v33  ;;  %vm217_vm3 = vweird.f32 %v211_v33 }
  0xa8   :  { %v233_v35 = vmul.f32 %v1342_v34, %v231_v31  ;;  %vm238_vm6 = vweird.f32 %v1342_v34 }
  0xa9   :  { %v224_v50 = vor.u32 1.1754944e-38, %v223_v42  ;;  %vm222_vm5 = vcmp.eq.f32.partialorder %v221_v44, 8.507059e+37  ;;  %vm239_vm8 = vmor %vm237_vm7, %vm238_vm6 }
  0xaa   :  { %v234_v38 = vsub.f32 1.0, %v233_v35 }
  0xac   :  { %v235_v46 = vmul.f32 %v1342_v34, %v234_v38 }
  0xad   :  { %v1344_v36 = vpop.eup %1343 }
  0xae   :  { %v213_v37 = vmul.f32 %v1344_v36, %v211_v33  ;;  %vm218_vm2 = vweird.f32 %v1344_v36  ;;  %v236_v53 = vadd.f32 %v1342_v34, %v235_v46 }
  0xaf   :  { %vm219_vm4 = vmor %vm217_vm3, %vm218_vm2 }
  0xb0   :  { %v214_v39 = vsub.f32 1.0, %v213_v37  ;;  %v240_v59 = vsel %vm239_vm8, %v1342_v34, %v236_v53 }
  0xb1   :  { %v245_v61 = vsel %vm242_vm9, %v244_v60, %v240_v59 }
  0xb2   :  { %v215_v43 = vmul.f32 %v1344_v36, %v214_v39  ;;  %v251_v62 = vsub.f32 1.0, %v245_v61  ;;  %v253_v1 = vmul.f32 0.0, %v245_v61 }
  0xb4   :  { %v216_v48 = vadd.f32 %v1344_v36, %v215_v43 }
  0xb6   :  { %v220_v51 = vsel %vm219_vm4, %v1344_v36, %v216_v48 }
  0xb7   :  { %v225_v54 = vsel %vm222_vm5, %v224_v50, %v220_v51 }
  0xb8   :  { %v248_v56 = vmul.f32 %v247_v49, %v225_v54 }
  0xba   :  { %v249_v58 = vadd.f32 %v248_v56, %v1591_v52 }
  0xbc   :  { %1345 = vtanh.f32 %v249_v58 }
  0xc2   :  { %v1346_v63 = vpop.eup %1345 }
  0xc3   :  { %v252_v0 = vmul.f32 %v1346_v63, %v251_v62 }
  0xc5   :  { %v1594_v2 = vadd.f32 %v253_v1, %v252_v0 }
  0xc7   :  { %1295 = vmatmul.msk.f32.vlgmr.msra.gmra.mxu0 %vm143_vm10, %v1594_v2  ;;  %1296 = vmatmul.msk.f32.vlgmr.msrb.gmra.mxu3 %vm143_vm10, %v1594_v2  ;;  %v373_v57 = vrot.slane %v1594_v2, 7 }
  0xc8   :  { %516 = vmatpush.msra.mxu0 %v1510_v3  ;;  %639 = vmatpush.msrb.mxu3 %v1510_v3 }
  0xca   :  { %517 = vmatpush.msra.mxu0 %v1516_v5  ;;  %640 = vmatpush.msrb.mxu3 %v1516_v5 }
  0xcc   :  { %518 = vmatpush.msra.mxu0 %v1522_v7  ;;  %641 = vmatpush.msrb.mxu3 %v1522_v7 }
  0xce   :  { %519 = vmatpush.msra.mxu0 %v1529_v10  ;;  %642 = vmatpush.msrb.mxu3 %v1529_v10 }
  0xcf   :  { %1297 = vmatmul.msk.f32.vlgmr.msrb.gmra.mxu0 %vm143_vm10, %v1594_v2 }
  0xd0   :  { %659 = vmatpush.msrb.mxu0 %v1512_v4 }
  0xd2   :  { %660 = vmatpush.msrb.mxu0 %v1518_v6 }
  0xd4   :  { %661 = vmatpush.msrb.mxu0 %v1524_v8 }
  0xd6   :  { %662 = vmatpush.msrb.mxu0 %v1531_v11 }
 0x144   :  { %v275_v9 = vpop.f32.mrf.mxu0 }
 0x145   :  { %v319_v13 = vrot.slane %v275_v9, 7 }
 0x147   :  { %v321_v17 = vadd.f32 %v319_v13, %v1585_v25 }
 0x149   :  { %v1298_v18 = vmul.f32 -1.442695, %v321_v17 }
 0x14a   :  { %v295_v19 = vpop.f32.mrf.mxu3 }
 0x14b   :  { %1347 = vpow2.f32 %v1298_v18  ;;  %v342_v20 = vrot.slane %v295_v19, 7 }
 0x14c   :  { %v315_v31 = vpop.f32.mrf.mxu0 }
 0x14d   :  { %v344_v21 = vadd.f32 %v342_v20, %v1582_v22  ;;  %v364_v36 = vadd.f32 %v315_v31, %v1588_v40 }
 0x14f   :  { %v1299_v23 = vmul.f32 -1.442695, %v344_v21  ;;  %v366_v44 = vrot.slane %v364_v36, 7 }
 0x151   :  { %v1348_v24 = vpop.eup %1347  ;;  %1349 = vpow2.f32 %v1299_v23 }
 0x152   :  { %v325_v26 = vadd.f32 1.0, %v1348_v24 }
 0x154   :  { %1351 = vrcp.f32 %v325_v26  ;;  %v337_v33 = vand.u32 2147483648, %v325_v26  ;;  %v335_v35 = vand.u32 2147483647, %v325_v26  ;;  %vm331_vm12 = vweird.f32 %v325_v26 }
 0x156   :  { %v338_v41 = vor.u32 1.1754944e-38, %v337_v33  ;;  %vm336_vm14 = vcmp.eq.f32.partialorder %v335_v35, 8.507059e+37 }
 0x157   :  { %v1350_v27 = vpop.eup %1349 }
 0x158   :  { %v348_v28 = vadd.f32 1.0, %v1350_v27 }
 0x15a   :  { %v1352_v29 = vpop.eup %1351  ;;  %1353 = vrcp.f32 %v348_v28  ;;  %v360_v48 = vand.u32 2147483648, %v348_v28  ;;  %v358_v49 = vand.u32 2147483647, %v348_v28  ;;  %vm354_vm0 = vweird.f32 %v348_v28 }
 0x15b   :  { %v327_v30 = vmul.f32 %v1352_v29, %v325_v26  ;;  %vm332_vm11 = vweird.f32 %v1352_v29 }
 0x15c   :  { %vm333_vm13 = vmor %vm331_vm12, %vm332_vm11  ;;  %v361_v54 = vor.u32 1.1754944e-38, %v360_v48  ;;  %vm359_vm2 = vcmp.eq.f32.partialorder %v358_v49, 8.507059e+37 }
 0x15d   :  { %v328_v32 = vsub.f32 1.0, %v327_v30 }
 0x15f   :  { %v329_v34 = vmul.f32 %v1352_v29, %v328_v32 }
 0x160   :  { %v1354_v37 = vpop.eup %1353 }
 0x161   :  { %v350_v38 = vmul.f32 %v1354_v37, %v348_v28  ;;  %v330_v39 = vadd.f32 %v1352_v29, %v329_v34  ;;  %vm355_vm15 = vweird.f32 %v1354_v37 }
 0x162   :  { %vm356_vm1 = vmor %vm354_vm0, %vm355_vm15 }
 0x163   :  { %v351_v42 = vsub.f32 1.0, %v350_v38  ;;  %v334_v43 = vsel %vm333_vm13, %v1352_v29, %v330_v39 }
 0x164   :  { %v339_v45 = vsel %vm336_vm14, %v338_v41, %v334_v43 }
 0x165   :  { %v368_v46 = vmul.f32 %v366_v44, %v339_v45  ;;  %v352_v47 = vmul.f32 %v1354_v37, %v351_v42 }
 0x167   :  { %v369_v50 = vadd.f32 %v368_v46, %v1591_v52  ;;  %v353_v51 = vadd.f32 %v1354_v37, %v352_v47 }
 0x169   :  { %1355 = vtanh.f32 %v369_v50  ;;  %v357_v53 = vsel %vm356_vm1, %v1354_v37, %v353_v51 }
 0x16a   :  { %v362_v55 = vsel %vm359_vm2, %v361_v54, %v357_v53 }
 0x16b   :  { %v371_v56 = vsub.f32 1.0, %v362_v55  ;;  %v375_v60 = vmul.f32 %v373_v57, %v362_v55 }
 0x16f   :  { %v1356_v58 = vpop.eup %1355 }
 0x170   :  { %v372_v59 = vmul.f32 %v1356_v58, %v371_v56 }
 0x172   :  { %v1619_v61 = vadd.f32 %v375_v60, %v372_v59 }
 0x174   :  { %v378_v62 = vrot.slane %v1619_v61, 1  ;;  %v496_v51 = vrot.slane %v1619_v61, 7 }
 0x176   :  { %1300 = vmatmul.msk.f32.vlgmr.msra.gmra.mxu1 %vm143_vm10, %v378_v62  ;;  %1301 = vmatmul.msk.f32.vlgmr.msrb.gmra.mxu2 %vm143_vm10, %v378_v62 }
 0x177   :  { %1302 = vmatmul.msk.f32.vlgmr.msra.gmra.mxu3 %vm143_vm10, %v378_v62  ;;  %679 = vmatpush.msra.mxu1 %v1537_v12 }
 0x178   :  { %762 = vmatpush.msrb.mxu2 %v1510_v3  ;;  %782 = vmatpush.msra.mxu3 %v1512_v4 }
 0x179   :  { %680 = vmatpush.msra.mxu1 %v1543_v14 }
 0x17a   :  { %763 = vmatpush.msrb.mxu2 %v1516_v5  ;;  %783 = vmatpush.msra.mxu3 %v1518_v6 }
 0x17b   :  { %681 = vmatpush.msra.mxu1 %v1547_v15 }
 0x17c   :  { %764 = vmatpush.msrb.mxu2 %v1522_v7  ;;  %784 = vmatpush.msra.mxu3 %v1524_v8 }
 0x17d   :  { %682 = vmatpush.msra.mxu1 %v1553_v16 }
 0x17e   :  { %765 = vmatpush.msrb.mxu2 %v1529_v10  ;;  %785 = vmatpush.msra.mxu3 %v1531_v11 }
 0x1f3   :  { %v398_v63 = vpop.f32.mrf.mxu1 }
 0x1f4   :  { %v442_v0 = vrot.slane %v398_v63, 6 }
 0x1f6   :  { %v444_v1 = vadd.f32 %v442_v0, %v1585_v25 }
 0x1f8   :  { %v1303_v2 = vmul.f32 -1.442695, %v444_v1 }
 0x1f9   :  { %v418_v9 = vpop.f32.mrf.mxu2 }
 0x1fa   :  { %1357 = vpow2.f32 %v1303_v2  ;;  %v465_v13 = vrot.slane %v418_v9, 6  ;;  %v438_v27 = vpop.f32.mrf.mxu3 }
 0x1fb   :  { %v487_v32 = vadd.f32 %v438_v27, %v1588_v40 }
 0x1fc   :  { %v467_v17 = vadd.f32 %v465_v13, %v1582_v22 }
 0x1fd   :  { %v489_v39 = vrot.slane %v487_v32, 6 }
 0x1fe   :  { %v1304_v18 = vmul.f32 -1.442695, %v467_v17 }
 0x200   :  { %v1358_v19 = vpop.eup %1357  ;;  %1359 = vpow2.f32 %v1304_v18 }
 0x201   :  { %v448_v20 = vadd.f32 1.0, %v1358_v19 }
 0x203   :  { %1361 = vrcp.f32 %v448_v20  ;;  %v460_v29 = vand.u32 2147483648, %v448_v20  ;;  %v458_v31 = vand.u32 2147483647, %v448_v20  ;;  %vm454_vm4 = vweird.f32 %v448_v20 }
 0x205   :  { %v461_v36 = vor.u32 1.1754944e-38, %v460_v29  ;;  %vm459_vm6 = vcmp.eq.f32.partialorder %v458_v31, 8.507059e+37 }
 0x206   :  { %v1360_v21 = vpop.eup %1359 }
 0x207   :  { %v471_v23 = vadd.f32 1.0, %v1360_v21 }
 0x209   :  { %v1362_v24 = vpop.eup %1361  ;;  %1363 = vrcp.f32 %v471_v23  ;;  %v483_v43 = vand.u32 2147483648, %v471_v23  ;;  %v481_v45 = vand.u32 2147483647, %v471_v23  ;;  %vm477_vm8 = vweird.f32 %v471_v23 }
 0x20a   :  { %v450_v26 = vmul.f32 %v1362_v24, %v448_v20  ;;  %vm455_vm3 = vweird.f32 %v1362_v24 }
 0x20b   :  { %vm456_vm5 = vmor %vm454_vm4, %vm455_vm3  ;;  %v484_v48 = vor.u32 1.1754944e-38, %v483_v43  ;;  %vm482_vm11 = vcmp.eq.f32.partialorder %v481_v45, 8.507059e+37 }
 0x20c   :  { %v451_v28 = vsub.f32 1.0, %v450_v26 }
 0x20e   :  { %v452_v30 = vmul.f32 %v1362_v24, %v451_v28 }
 0x20f   :  { %v1364_v33 = vpop.eup %1363 }
 0x210   :  { %v473_v34 = vmul.f32 %v1364_v33, %v471_v23  ;;  %v453_v35 = vadd.f32 %v1362_v24, %v452_v30  ;;  %vm478_vm7 = vweird.f32 %v1364_v33 }
 0x211   :  { %vm479_vm9 = vmor %vm477_vm8, %vm478_vm7 }
 0x212   :  { %v474_v37 = vsub.f32 1.0, %v473_v34  ;;  %v457_v38 = vsel %vm456_vm5, %v1362_v24, %v453_v35 }
 0x213   :  { %v462_v41 = vsel %vm459_vm6, %v461_v36, %v457_v38 }
 0x214   :  { %v475_v42 = vmul.f32 %v1364_v33, %v474_v37  ;;  %v491_v44 = vmul.f32 %v489_v39, %v462_v41 }
 0x216   :  { %v476_v46 = vadd.f32 %v1364_v33, %v475_v42  ;;  %v492_v47 = vadd.f32 %v491_v44, %v1591_v52 }
 0x218   :  { %v480_v49 = vsel %vm479_vm9, %v1364_v33, %v476_v46  ;;  %1365 = vtanh.f32 %v492_v47 }
 0x219   :  { %v485_v50 = vsel %vm482_vm11, %v484_v48, %v480_v49 }
 0x21a   :  { %v494_v53 = vsub.f32 1.0, %v485_v50  ;;  %v498_v56 = vmul.f32 %v496_v51, %v485_v50 }
 0x21e   :  { %v1366_v54 = vpop.eup %1365 }
 0x21f   :  { %v495_v55 = vmul.f32 %v1366_v54, %v494_v53 }
 0x221   :  { %v1642_v57 = vadd.f32 %v498_v56, %v495_v55 }
 0x223   :  { %v501_v58 = vrot.slane %v1642_v57, 2  ;;  %v619_v47 = vrot.slane %v1642_v57, 7 }
 0x225   :  { %1305 = vmatmul.msk.f32.vlgmr.msra.gmra.mxu0 %vm143_vm10, %v501_v58  ;;  %1306 = vmatmul.msk.f32.vlgmr.msrb.gmra.mxu1 %vm143_vm10, %v501_v58 }
 0x226   :  { %1307 = vmatmul.msk.f32.vlgmr.msra.gmra.mxu2 %vm143_vm10, %v501_v58  ;;  %802 = vmatpush.msra.mxu0 %v1537_v12 }
 0x227   :  { %885 = vmatpush.msrb.mxu1 %v1510_v3  ;;  %905 = vmatpush.msra.mxu2 %v1512_v4 }
 0x228   :  { %803 = vmatpush.msra.mxu0 %v1543_v14 }
 0x229   :  { %886 = vmatpush.msrb.mxu1 %v1516_v5  ;;  %906 = vmatpush.msra.mxu2 %v1518_v6 }
 0x22a   :  { %804 = vmatpush.msra.mxu0 %v1547_v15 }
 0x22b   :  { %887 = vmatpush.msrb.mxu1 %v1522_v7  ;;  %907 = vmatpush.msra.mxu2 %v1524_v8 }
 0x22c   :  { %805 = vmatpush.msra.mxu0 %v1553_v16 }
 0x22d   :  { %888 = vmatpush.msrb.mxu1 %v1529_v10  ;;  %908 = vmatpush.msra.mxu2 %v1531_v11 }
 0x2a2   :  { %v521_v59 = vpop.f32.mrf.mxu0  ;;  %v541_v60 = vpop.f32.mrf.mxu1 }
 0x2a3   :  { %v565_v61 = vrot.slane %v521_v59, 5  ;;  %v588_v62 = vrot.slane %v541_v60, 5 }
 0x2a5   :  { %v567_v63 = vadd.f32 %v565_v61, %v1585_v25  ;;  %v590_v0 = vadd.f32 %v588_v62, %v1582_v22 }
 0x2a7   :  { %v1308_v1 = vmul.f32 -1.442695, %v567_v63  ;;  %v1309_v2 = vmul.f32 -1.442695, %v590_v0 }
 0x2a9   :  { %1367 = vpow2.f32 %v1308_v1  ;;  %v561_v24 = vpop.f32.mrf.mxu2 }
 0x2aa   :  { %1369 = vpow2.f32 %v1309_v2  ;;  %v610_v31 = vadd.f32 %v561_v24, %v1588_v40 }
 0x2ac   :  { %v612_v36 = vrot.slane %v610_v31, 5 }
 0x2af   :  { %v1368_v9 = vpop.eup %1367 }
 0x2b0   :  { %v1370_v13 = vpop.eup %1369  ;;  %v571_v17 = vadd.f32 1.0, %v1368_v9 }
 0x2b1   :  { %v594_v18 = vadd.f32 1.0, %v1370_v13 }
 0x2b2   :  { %1371 = vrcp.f32 %v571_v17  ;;  %v583_v28 = vand.u32 2147483648, %v571_v17  ;;  %v581_v30 = vand.u32 2147483647, %v571_v17  ;;  %vm577_vm13 = vweird.f32 %v571_v17 }
 0x2b3   :  { %1373 = vrcp.f32 %v594_v18  ;;  %v606_v39 = vand.u32 2147483648, %v594_v18  ;;  %vm600_vm1 = vweird.f32 %v594_v18  ;;  %v604_v42 = vand.u32 2147483647, %v594_v18 }
 0x2b4   :  { %v584_v34 = vor.u32 1.1754944e-38, %v583_v28  ;;  %vm582_vm15 = vcmp.eq.f32.partialorder %v581_v30, 8.507059e+37 }
 0x2b5   :  { %v607_v45 = vor.u32 1.1754944e-38, %v606_v39  ;;  %vm605_vm3 = vcmp.eq.f32.partialorder %v604_v42, 8.507059e+37 }
 0x2b8   :  { %v1372_v19 = vpop.eup %1371 }
 0x2b9   :  { %v1374_v20 = vpop.eup %1373  ;;  %v573_v21 = vmul.f32 %v1372_v19, %v571_v17  ;;  %vm578_vm12 = vweird.f32 %v1372_v19 }
 0x2ba   :  { %v596_v23 = vmul.f32 %v1374_v20, %v594_v18  ;;  %vm579_vm14 = vmor %vm577_vm13, %vm578_vm12  ;;  %vm601_vm0 = vweird.f32 %v1374_v20 }
 0x2bb   :  { %v574_v26 = vsub.f32 1.0, %v573_v21  ;;  %vm602_vm2 = vmor %vm600_vm1, %vm601_vm0 }
 0x2bc   :  { %v597_v27 = vsub.f32 1.0, %v596_v23 }
 0x2bd   :  { %v575_v29 = vmul.f32 %v1372_v19, %v574_v26 }
 0x2be   :  { %v598_v32 = vmul.f32 %v1374_v20, %v597_v27 }
 0x2bf   :  { %v576_v33 = vadd.f32 %v1372_v19, %v575_v29 }
 0x2c0   :  { %v599_v38 = vadd.f32 %v1374_v20, %v598_v32 }
 0x2c1   :  { %v580_v35 = vsel %vm579_vm14, %v1372_v19, %v576_v33 }
 0x2c2   :  { %v585_v37 = vsel %vm582_vm15, %v584_v34, %v580_v35  ;;  %v603_v44 = vsel %vm602_vm2, %v1374_v20, %v599_v38 }
 0x2c3   :  { %v614_v41 = vmul.f32 %v612_v36, %v585_v37  ;;  %v608_v46 = vsel %vm605_vm3, %v607_v45, %v603_v44 }
 0x2c4   :  { %v617_v48 = vsub.f32 1.0, %v608_v46  ;;  %v621_v51 = vmul.f32 %v619_v47, %v608_v46 }
 0x2c5   :  { %v615_v43 = vadd.f32 %v614_v41, %v1591_v52 }
 0x2c7   :  { %1375 = vtanh.f32 %v615_v43 }
 0x2cd   :  { %v1376_v49 = vpop.eup %1375 }
 0x2ce   :  { %v618_v50 = vmul.f32 %v1376_v49, %v617_v48 }
 0x2d0   :  { %v1665_v53 = vadd.f32 %v621_v51, %v618_v50 }
 0x2d2   :  { %v624_v54 = vrot.slane %v1665_v53, 3  ;;  %v742_v34 = vrot.slane %v1665_v53, 7 }
 0x2d4   :  { %1310 = vmatmul.msk.f32.vlgmr.msrb.gmra.mxu3 %vm143_vm10, %v624_v54  ;;  %1311 = vmatmul.msk.f32.vlgmr.msrb.gmra.mxu0 %vm143_vm10, %v624_v54 }
 0x2d5   :  { %1312 = vmatmul.msk.f32.vlgmr.msra.gmra.mxu1 %vm143_vm10, %v624_v54  ;;  %925 = vmatpush.msrb.mxu3 %v1537_v12 }
 0x2d6   :  { %1008 = vmatpush.msrb.mxu0 %v1510_v3  ;;  %1028 = vmatpush.msra.mxu1 %v1512_v4 }
 0x2d7   :  { %926 = vmatpush.msrb.mxu3 %v1543_v14 }
 0x2d8   :  { %1009 = vmatpush.msrb.mxu0 %v1516_v5  ;;  %1029 = vmatpush.msra.mxu1 %v1518_v6 }
 0x2d9   :  { %927 = vmatpush.msrb.mxu3 %v1547_v15 }
 0x2da   :  { %1010 = vmatpush.msrb.mxu0 %v1522_v7  ;;  %1030 = vmatpush.msra.mxu1 %v1524_v8 }
 0x2db   :  { %928 = vmatpush.msrb.mxu3 %v1553_v16 }
 0x2dc   :  { %1011 = vmatpush.msrb.mxu0 %v1529_v10  ;;  %1031 = vmatpush.msra.mxu1 %v1531_v11 }
 0x351   :  { %v664_v3 = vpop.f32.mrf.mxu0 }
 0x352   :  { %v711_v4 = vrot.slane %v664_v3, 4  ;;  %v684_v0 = vpop.f32.mrf.mxu1 }
 0x353   :  { %v733_v9 = vadd.f32 %v684_v0, %v1588_v40 }
 0x354   :  { %v713_v55 = vadd.f32 %v711_v4, %v1582_v22 }
 0x355   :  { %v735_v21 = vrot.slane %v733_v9, 4 }
 0x356   :  { %v1314_v56 = vmul.f32 -1.442695, %v713_v55 }
 0x357   :  { %v644_v5 = vpop.f32.mrf.mxu3 }
 0x358   :  { %1377 = vpow2.f32 %v1314_v56  ;;  %v688_v6 = vrot.slane %v644_v5, 4 }
 0x35a   :  { %v690_v57 = vadd.f32 %v688_v6, %v1585_v25 }
 0x35c   :  { %v1313_v58 = vmul.f32 -1.442695, %v690_v57 }
 0x35e   :  { %v1378_v7 = vpop.eup %1377  ;;  %1379 = vpow2.f32 %v1313_v58 }
 0x35f   :  { %v717_v8 = vadd.f32 1.0, %v1378_v7 }
 0x361   :  { %1381 = vrcp.f32 %v717_v8  ;;  %v729_v27 = vand.u32 2147483648, %v717_v8  ;;  %vm723_vm9 = vweird.f32 %v717_v8  ;;  %v727_v29 = vand.u32 2147483647, %v717_v8 }
 0x363   :  { %v730_v32 = vor.u32 1.1754944e-38, %v729_v27  ;;  %vm728_vm12 = vcmp.eq.f32.partialorder %v727_v29, 8.507059e+37 }
 0x364   :  { %v1380_v59 = vpop.eup %1379 }
 0x365   :  { %v694_v60 = vadd.f32 1.0, %v1380_v59 }
 0x367   :  { %1383 = vrcp.f32 %v694_v60  ;;  %v1382_v10 = vpop.eup %1381  ;;  %v706_v2 = vand.u32 2147483648, %v694_v60  ;;  %v704_v17 = vand.u32 2147483647, %v694_v60  ;;  %vm700_vm5 = vweird.f32 %v694_v60 }
 0x368   :  { %v719_v11 = vmul.f32 %v1382_v10, %v717_v8  ;;  %vm724_vm8 = vweird.f32 %v1382_v10 }
 0x369   :  { %v707_v20 = vor.u32 1.1754944e-38, %v706_v2  ;;  %vm705_vm7 = vcmp.eq.f32.partialorder %v704_v17, 8.507059e+37  ;;  %vm725_vm11 = vmor %vm723_vm9, %vm724_vm8 }
 0x36a   :  { %v720_v63 = vsub.f32 1.0, %v719_v11 }
 0x36c   :  { %v721_v18 = vmul.f32 %v1382_v10, %v720_v63 }
 0x36d   :  { %v1384_v61 = vpop.eup %1383 }
 0x36e   :  { %v696_v62 = vmul.f32 %v1384_v61, %v694_v60  ;;  %vm701_vm4 = vweird.f32 %v1384_v61  ;;  %v722_v24 = vadd.f32 %v1382_v10, %v721_v18 }
 0x36f   :  { %vm702_vm6 = vmor %vm700_vm5, %vm701_vm4 }
 0x370   :  { %v697_v1 = vsub.f32 1.0, %v696_v62  ;;  %v726_v31 = vsel %vm725_vm11, %v1382_v10, %v722_v24 }
 0x371   :  { %v731_v33 = vsel %vm728_vm12, %v730_v32, %v726_v31 }
 0x372   :  { %v698_v13 = vmul.f32 %v1384_v61, %v697_v1  ;;  %v740_v35 = vsub.f32 1.0, %v731_v33  ;;  %v744_v38 = vmul.f32 %v742_v34, %v731_v33 }
 0x374   :  { %v699_v19 = vadd.f32 %v1384_v61, %v698_v13 }
 0x376   :  { %v703_v23 = vsel %vm702_vm6, %v1384_v61, %v699_v19 }
 0x377   :  { %v708_v26 = vsel %vm705_vm7, %v707_v20, %v703_v23 }
 0x378   :  { %v737_v28 = vmul.f32 %v735_v21, %v708_v26 }
 0x37a   :  { %v738_v30 = vadd.f32 %v737_v28, %v1591_v52 }
 0x37c   :  { %1385 = vtanh.f32 %v738_v30 }
 0x382   :  { %v1386_v36 = vpop.eup %1385 }
 0x383   :  { %v741_v37 = vmul.f32 %v1386_v36, %v740_v35 }
 0x385   :  { %v1688_v39 = vadd.f32 %v744_v38, %v741_v37 }
 0x387   :  { %v747_v41 = vrot.slane %v1688_v39, 4  ;;  %v865_v13 = vrot.slane %v1688_v39, 7 }
 0x389   :  { %1315 = vmatmul.msk.f32.vlgmr.msrb.gmra.mxu2 %vm143_vm10, %v747_v41  ;;  %1316 = vmatmul.msk.f32.vlgmr.msra.gmra.mxu3 %vm143_vm10, %v747_v41 }
 0x38a   :  { %1317 = vmatmul.msk.f32.vlgmr.msra.gmra.mxu0 %vm143_vm10, %v747_v41  ;;  %1048 = vmatpush.msrb.mxu2 %v1537_v12 }
 0x38c   :  { %1049 = vmatpush.msrb.mxu2 %v1543_v14 }
 0x38e   :  { %1050 = vmatpush.msrb.mxu2 %v1547_v15 }
 0x390   :  { %1051 = vmatpush.msrb.mxu2 %v1553_v16 }
 0x407   :  { %v807_v54 = vpop.f32.mrf.mxu0 }
 0x408   :  { %v856_v5 = vadd.f32 %v807_v54, %v1588_v40 }
 0x40a   :  { %v858_v59 = vrot.slane %v856_v5, 3 }
 0x40c   :  { %v767_v42 = vpop.f32.mrf.mxu2  ;;  %v787_v43 = vpop.f32.mrf.mxu3 }
 0x40d   :  { %v811_v44 = vrot.slane %v767_v42, 3  ;;  %v834_v45 = vrot.slane %v787_v43, 3 }
 0x40f   :  { %v813_v46 = vadd.f32 %v811_v44, %v1585_v25  ;;  %v836_v47 = vadd.f32 %v834_v45, %v1582_v22 }
 0x411   :  { %v1318_v48 = vmul.f32 -1.442695, %v813_v46  ;;  %v1319_v49 = vmul.f32 -1.442695, %v836_v47 }
 0x413   :  { %1387 = vpow2.f32 %v1318_v48 }
 0x414   :  { %1389 = vpow2.f32 %v1319_v49 }
 0x419   :  { %v1388_v50 = vpop.eup %1387 }
 0x41a   :  { %v1390_v12 = vpop.eup %1389  ;;  %v817_v51 = vadd.f32 1.0, %v1388_v50 }
 0x41b   :  { %v840_v14 = vadd.f32 1.0, %v1390_v12 }
 0x41c   :  { %1391 = vrcp.f32 %v817_v51  ;;  %v829_v55 = vand.u32 2147483648, %v817_v51  ;;  %v827_v57 = vand.u32 2147483647, %v817_v51  ;;  %vm823_vm14 = vweird.f32 %v817_v51 }
 0x41d   :  { %1393 = vrcp.f32 %v840_v14  ;;  %v852_v62 = vand.u32 2147483648, %v840_v14  ;;  %vm846_vm2 = vweird.f32 %v840_v14  ;;  %v850_v63 = vand.u32 2147483647, %v840_v14 }
 0x41e   :  { %v830_v8 = vor.u32 1.1754944e-38, %v829_v55  ;;  %vm828_vm0 = vcmp.eq.f32.partialorder %v827_v57, 8.507059e+37 }
 0x41f   :  { %v853_v2 = vor.u32 1.1754944e-38, %v852_v62  ;;  %vm851_vm4 = vcmp.eq.f32.partialorder %v850_v63, 8.507059e+37 }
 0x422   :  { %v1392_v15 = vpop.eup %1391 }
 0x423   :  { %v1394_v16 = vpop.eup %1393  ;;  %v819_v53 = vmul.f32 %v1392_v15, %v817_v51  ;;  %vm824_vm13 = vweird.f32 %v1392_v15 }
 0x424   :  { %v842_v3 = vmul.f32 %v1394_v16, %v840_v14  ;;  %vm825_vm15 = vmor %vm823_vm14, %vm824_vm13  ;;  %vm847_vm1 = vweird.f32 %v1394_v16 }
 0x425   :  { %v820_v4 = vsub.f32 1.0, %v819_v53  ;;  %vm848_vm3 = vmor %vm846_vm2, %vm847_vm1 }
 0x426   :  { %v843_v56 = vsub.f32 1.0, %v842_v3 }
 0x427   :  { %v821_v6 = vmul.f32 %v1392_v15, %v820_v4 }
 0x428   :  { %v844_v58 = vmul.f32 %v1394_v16, %v843_v56 }
 0x429   :  { %v822_v7 = vadd.f32 %v1392_v15, %v821_v6 }
 0x42a   :  { %v845_v11 = vadd.f32 %v1394_v16, %v844_v58 }
 0x42b   :  { %v826_v60 = vsel %vm825_vm15, %v1392_v15, %v822_v7 }
 0x42c   :  { %v831_v10 = vsel %vm828_vm0, %v830_v8, %v826_v60  ;;  %v849_v1 = vsel %vm848_vm3, %v1394_v16, %v845_v11 }
 0x42d   :  { %v860_v61 = vmul.f32 %v858_v59, %v831_v10  ;;  %v854_v9 = vsel %vm851_vm4, %v853_v2, %v849_v1  ;;  %v1121_v2 = vld [vmem:[#allocation2 + $0xc0] sm:$0xff] }
 0x42e   :  { %v863_v17 = vsub.f32 1.0, %v854_v9  ;;  %v867_v20 = vmul.f32 %v865_v13, %v854_v9  ;;  %v1122_v9 = vld [vmem:[#allocation2 + $0xc8] sm:$0xff]  ;;  %1179 = vmatpush.msra.mxu3 %v1121_v2 }
 0x42f   :  { %v861_v0 = vadd.f32 %v860_v61, %v1591_v52  ;;  %1199 = vmatpush.msra.mxu0 %v1122_v9  ;;  %v1119_v13 = vld [vmem:[#allocation2 + $0xa8] sm:$0xff] }
 0x430   :  { %1180 = vmatpush.msra.mxu3 %v1119_v13 }
 0x431   :  { %1395 = vtanh.f32 %v861_v0 }
 0x437   :  { %v1396_v18 = vpop.eup %1395 }
 0x438   :  { %v864_v19 = vmul.f32 %v1396_v18, %v863_v17  ;;  %v1120_v17 = vld [vmem:[#allocation2 + $0xb0] sm:$0xff] }
 0x439   :  { %1200 = vmatpush.msra.mxu0 %v1120_v17 }
 0x43a   :  { %v868_v21 = vadd.f32 %v867_v20, %v864_v19  ;;  %v1117_v19 = vld [vmem:[#allocation2 + $0x90] sm:$0xff]  ;;  %v1118_v20 = vld [vmem:[#allocation2 + $0x98] sm:$0xff] }
 0x43b   :  { %1181 = vmatpush.msra.mxu3 %v1117_v19  ;;  %1201 = vmatpush.msra.mxu0 %v1118_v20  ;;  %v1130_v19 = vld [vmem:[#allocation2 + $0x150] sm:$0xff]  ;;  %v1143_v20 = vld [vmem:[#allocation2 + $0x288] sm:$0xff] }
 0x43c   :  { %v870_v23 = vrot.slane %v868_v21, 5  ;;  %v988_v5 = vrot.slane %v868_v21, 7 }
 0x43e   :  { %1320 = vmatmul.msk.f32.vlgmr.msrb.gmra.mxu1 %vm143_vm10, %v870_v23  ;;  %1321 = vmatmul.msk.f32.vlgmr.msra.gmra.mxu2 %vm143_vm10, %v870_v23 }
 0x43f   :  { %1322 = vmatmul.msk.f32.vlgmr.msrb.gmra.mxu3 %vm143_vm10, %v870_v23 }
 0x4bb   :  { %v890_v24 = vpop.f32.mrf.mxu1 }
 0x4bc   :  { %v934_v26 = vrot.slane %v890_v24, 2  ;;  %v1116_v24 = vld [vmem:[#allocation2 + $0x80] sm:$0xff] }
 0x4bd   :  { %1202 = vmatpush.msra.mxu0 %v1116_v24  ;;  %v1126_v24 = vld [vmem:[#allocation2 + $0xf0] sm:$0xff] }
 0x4be   :  { %v936_v27 = vadd.f32 %v934_v26, %v1585_v25  ;;  %v1156_v26 = vld [vmem:[#allocation2 + $0x3c0] sm:$0xff] }
 0x4bf   :  { %1229 = vmatpush.msra.mxu2 %v1156_v26  ;;  %v1125_v26 = vld [vmem:[#allocation2 + $0xd8] sm:$0xff] }
 0x4c0   :  { %v1323_v28 = vmul.f32 -1.442695, %v936_v27  ;;  %v1155_v27 = vld [vmem:[#allocation2 + $0x3a8] sm:$0xff] }
 0x4c1   :  { %v910_v29 = vpop.f32.mrf.mxu2  ;;  %1230 = vmatpush.msra.mxu2 %v1155_v27  ;;  %v1124_v27 = vld [vmem:[#allocation4 + $0x2] ss:$8 sm:$0x3] }
 0x4c2   :  { %1397 = vpow2.f32 %v1323_v28  ;;  %v957_v30 = vrot.slane %v910_v29, 2  ;;  %v930_v39 = vpop.f32.mrf.mxu3  ;;  %v1140_v28 = vld [vmem:[#allocation2 + $0x240] sm:$0xff]  ;;  %v1139_v29 = vld [vmem:[#allocation2 + $0x228] sm:$0xff] }
 0x4c3   :  { %v979_v45 = vadd.f32 %v930_v39, %v1588_v40  ;;  %1209 = vmatpush.msrb.mxu1 %v1140_v28  ;;  %v1152_v39 = vld [vmem:[#allocation2 + $0x360] sm:$0xff]  ;;  %v1162_v28 = vperm.slane %v1124_v27, 1 }
 0x4c4   :  { %v959_v31 = vadd.f32 %v957_v30, %v1582_v22  ;;  %v1154_v30 = vld [vmem:[#allocation2 + $0x390] sm:$0xff] }
 0x4c5   :  { %v981_v51 = vrot.slane %v979_v45, 2  ;;  %1210 = vmatpush.msrb.mxu1 %v1139_v29  ;;  %1231 = vmatpush.msra.mxu2 %v1154_v30  ;;  %v1151_v45 = vld [vmem:[#allocation2 + $0x348] sm:$0xff] }
 0x4c6   :  { %v1324_v32 = vmul.f32 -1.442695, %v959_v31  ;;  %v1138_v31 = vld [vmem:[#allocation2 + $0x210] sm:$0xff] }
 0x4c7   :  { %1211 = vmatpush.msrb.mxu1 %v1138_v31 }
 0x4c8   :  { %v1398_v33 = vpop.eup %1397  ;;  %1399 = vpow2.f32 %v1324_v32 }
 0x4c9   :  { %v940_v34 = vadd.f32 1.0, %v1398_v33  ;;  %v1153_v33 = vld [vmem:[#allocation2 + $0x378] sm:$0xff] }
 0x4ca   :  { %1232 = vmatpush.msra.mxu2 %v1153_v33 }
 0x4cb   :  { %1401 = vrcp.f32 %v940_v34  ;;  %v952_v42 = vand.u32 2147483648, %v940_v34  ;;  %v950_v44 = vand.u32 2147483647, %v940_v34  ;;  %vm946_vm6 = vweird.f32 %v940_v34 }
 0x4cc   :  { %1233 = vmatpush.msra.mxu2 %v1152_v39 }
 0x4cd   :  { %v953_v49 = vor.u32 1.1754944e-38, %v952_v42  ;;  %vm951_vm8 = vcmp.eq.f32.partialorder %v950_v44, 8.507059e+37  ;;  %v1136_v42 = vld [vmem:[#allocation2 + $0x1e0] sm:$0xff] }
 0x4ce   :  { %v1400_v35 = vpop.eup %1399  ;;  %1234 = vmatpush.msra.mxu2 %v1151_v45 }
 0x4cf   :  { %v963_v36 = vadd.f32 1.0, %v1400_v35 }
 0x4d1   :  { %v1402_v37 = vpop.eup %1401  ;;  %1403 = vrcp.f32 %v963_v36  ;;  %v975_v16 = vand.u32 2147483648, %v963_v36  ;;  %v973_v54 = vand.u32 2147483647, %v963_v36  ;;  %vm969_vm11 = vweird.f32 %v963_v36 }
 0x4d2   :  { %v942_v38 = vmul.f32 %v1402_v37, %v940_v34  ;;  %vm947_vm5 = vweird.f32 %v1402_v37 }
 0x4d3   :  { %vm948_vm7 = vmor %vm946_vm6, %vm947_vm5  ;;  %v976_v4 = vor.u32 1.1754944e-38, %v975_v16  ;;  %vm974_vm13 = vcmp.eq.f32.partialorder %v973_v54, 8.507059e+37  ;;  %vm1253_vm6 = vcmask 1040384  }
 0x4d4   :  { %v943_v41 = vsub.f32 1.0, %v942_v38 }
 0x4d6   :  { %v944_v43 = vmul.f32 %v1402_v37, %v943_v41 }
 0x4d7   :  { %v1404_v46 = vpop.eup %1403 }
 0x4d8   :  { %v965_v47 = vmul.f32 %v1404_v46, %v963_v36  ;;  %v945_v48 = vadd.f32 %v1402_v37, %v944_v43  ;;  %vm970_vm9 = vweird.f32 %v1404_v46  ;;  %v1137_v36 = vld [vmem:[#allocation2 + $0x1f8] sm:$0xff] }
 0x4d9   :  { %vm971_vm12 = vmor %vm969_vm11, %vm970_vm9  ;;  %1212 = vmatpush.msrb.mxu1 %v1137_v36  ;;  %v1249_v36 = vlaneseq }
 0x4da   :  { %v966_v50 = vsub.f32 1.0, %v965_v47  ;;  %v949_v12 = vsel %vm948_vm7, %v1402_v37, %v945_v48  ;;  %v1421_v48 = vld [vmem:[#allocation4 + $0x1] ss:$0 sm:$0xff] }
 0x4db   :  { %v954_v14 = vsel %vm951_vm8, %v953_v49, %v949_v12  ;;  %1213 = vmatpush.msrb.mxu1 %v1136_v42 }
 0x4dc   :  { %v967_v15 = vmul.f32 %v1404_v46, %v966_v50  ;;  %v983_v53 = vmul.f32 %v981_v51, %v954_v14  ;;  %v1135_v50 = vld [vmem:[#allocation2 + $0x1c8] sm:$0xff]  ;;  %v1150_v51 = vld [vmem:[#allocation2 + $0x330] sm:$0xff] }
 0x4dd   :  { %1214 = vmatpush.msrb.mxu1 %v1135_v50  ;;  %1235 = vmatpush.msra.mxu2 %v1150_v51 }
 0x4de   :  { %v968_v3 = vadd.f32 %v1404_v46, %v967_v15  ;;  %v984_v40 = vadd.f32 %v983_v53, %v1591_v52  ;;  %v1134_v15 = vld [vmem:[#allocation2 + $0x1b0] sm:$0xff]  ;;  %v1149_v53 = vld [vmem:[#allocation2 + $0x318] sm:$0xff] }
 0x4df   :  { %1215 = vmatpush.msrb.mxu1 %v1134_v15  ;;  %1236 = vmatpush.msra.mxu2 %v1149_v53 }
 0x4e0   :  { %v972_v55 = vsel %vm971_vm12, %v1404_v46, %v968_v3  ;;  %1405 = vtanh.f32 %v984_v40  ;;  %v1133_v40 = vld [vmem:[#allocation2 + $0x198] sm:$0xff] }
 0x4e1   :  { %v977_v56 = vsel %vm974_vm13, %v976_v4, %v972_v55  ;;  %1216 = vmatpush.msrb.mxu1 %v1133_v40 }
 0x4e2   :  { %v986_v6 = vsub.f32 1.0, %v977_v56  ;;  %v990_v7 = vmul.f32 %v988_v5, %v977_v56  ;;  %v1148_v56 = vld [vmem:[#allocation2 + $0x300] sm:$0xff] }
 0x4e3   :  { %1237 = vmatpush.msra.mxu2 %v1148_v56 }
 0x4e6   :  { %v1406_v57 = vpop.eup %1405 }
 0x4e7   :  { %v987_v58 = vmul.f32 %v1406_v57, %v986_v6  ;;  %v1132_v57 = vld [vmem:[#allocation2 + $0x180] sm:$0xff] }
 0x4e8   :  { %1217 = vmatpush.msrb.mxu1 %v1132_v57 }
 0x4e9   :  { %v1710_v8 = vadd.f32 %v990_v7, %v987_v58  ;;  %v1147_v7 = vld [vmem:[#allocation2 + $0x2e8] sm:$0xff] }
 0x4ea   :  { %1238 = vmatpush.msra.mxu2 %v1147_v7 }
 0x4eb   :  { %v993_v59 = vrot.slane %v1710_v8, 6 }
 0x4ed   :  { %1325 = vmatmul.msk.f32.vlgmr.msrb.gmra.mxu0 %vm143_vm10, %v993_v59  ;;  %1326 = vmatmul.msk.f32.vlgmr.msra.gmra.mxu1 %vm143_vm10, %v993_v59 }
 0x4ee   :  { %1327 = vmatmul.msk.f32.vlgmr.msrb.gmra.mxu2 %vm143_vm10, %v993_v59 }
 0x56a   :  { %v1013_v60 = vpop.f32.mrf.mxu0  ;;  %v1033_v10 = vpop.f32.mrf.mxu1 }
 0x56b   :  { %v1057_v11 = vrot.slane %v1013_v60, 1  ;;  %v1080_v61 = vrot.slane %v1033_v10, 1  ;;  %v1131_v60 = vld [vmem:[#allocation2 + $0x168] sm:$0xff] }
 0x56c   :  { %1218 = vmatpush.msrb.mxu1 %v1131_v60 }
 0x56d   :  { %v1059_v62 = vadd.f32 %v1057_v11, %v1585_v25  ;;  %v1082_v63 = vadd.f32 %v1080_v61, %v1582_v22  ;;  %v1115_v22 = vld [vmem:[#allocation2 + $0x78] sm:$0xff]  ;;  %v1146_v11 = vld [vmem:[#allocation2 + $0x2d0] sm:$0xff] }
 0x56e   :  { %1182 = vmatpush.msra.mxu3 %v1115_v22  ;;  %1239 = vmatpush.msra.mxu2 %v1146_v11  ;;  %v1127_v22 = vld [vmem:[#allocation2 + $0x108] sm:$0xff] }
 0x56f   :  { %v1328_v0 = vmul.f32 -1.442695, %v1059_v62  ;;  %v1329_v1 = vmul.f32 -1.442695, %v1082_v63  ;;  %v1145_v62 = vld [vmem:[#allocation2 + $0x2b8] sm:$0xff]  ;;  %1219 = vmatpush.msrb.mxu1 %v1130_v19 }
 0x570   :  { %1240 = vmatpush.msra.mxu2 %v1145_v62 }
 0x571   :  { %1407 = vpow2.f32 %v1328_v0  ;;  %v1053_v38 = vpop.f32.mrf.mxu2  ;;  %v1144_v0 = vld [vmem:[#allocation2 + $0x2a0] sm:$0xff] }
 0x572   :  { %1409 = vpow2.f32 %v1329_v1  ;;  %v1102_v49 = vadd.f32 %v1421_v48, %v1053_v38  ;;  %v1111_v1 = vrot.slane %v1710_v8, 7  ;;  %1241 = vmatpush.msra.mxu2 %v1144_v0  ;;  %v1128_v8 = vld [vmem:[#allocation2 + $0x120] sm:$0xff]  ;;  %v1250_v38 = vand.u32 127, %v1249_v36 }
 0x574   :  { %v1104_v3 = vrot.slane %v1102_v49, 1  ;;  %1242 = vmatpush.msra.mxu2 %v1143_v20 }
 0x577   :  { %v1408_v18 = vpop.eup %1407 }
 0x578   :  { %v1410_v21 = vpop.eup %1409  ;;  %v1063_v23 = vadd.f32 1.0, %v1408_v18 }
 0x579   :  { %v1718_v25 = vadd.f32 1.0, %v1410_v21  ;;  %v1129_v21 = vld [vmem:[#allocation2 + $0x138] sm:$0xff] }
 0x57a   :  { %1411 = vrcp.f32 %v1063_v23  ;;  %v1075_v44 = vand.u32 2147483648, %v1063_v23  ;;  %v1073_v47 = vand.u32 2147483647, %v1063_v23  ;;  %vm1069_vm15 = vweird.f32 %v1063_v23  ;;  %1220 = vmatpush.msrb.mxu1 %v1129_v21 }
 0x57b   :  { %1413 = vrcp.f32 %v1718_v25  ;;  %v1098_v5 = vand.u32 2147483648, %v1718_v25  ;;  %vm1092_vm3 = vweird.f32 %v1718_v25  ;;  %v1096_v58 = vand.u32 2147483647, %v1718_v25 }
 0x57c   :  { %v1076_v16 = vor.u32 1.1754944e-38, %v1075_v44  ;;  %vm1074_vm1 = vcmp.eq.f32.partialorder %v1073_v47, 8.507059e+37  ;;  %1221 = vmatpush.msrb.mxu1 %v1128_v8 }
 0x57d   :  { %v1099_v61 = vor.u32 1.1754944e-38, %v1098_v5  ;;  %vm1097_vm5 = vcmp.eq.f32.partialorder %v1096_v58, 8.507059e+37 }
 0x57e   :  { %1222 = vmatpush.msrb.mxu1 %v1127_v22 }
 0x580   :  { %v1412_v32 = vpop.eup %1411  ;;  %1223 = vmatpush.msrb.mxu1 %v1126_v24 }
 0x581   :  { %v1721_v34 = vpop.eup %1413  ;;  %v1065_v35 = vmul.f32 %v1412_v32, %v1063_v23  ;;  %vm1070_vm14 = vweird.f32 %v1412_v32  ;;  %v1142_v23 = vld [vmem:[#allocation2 + $0x270] sm:$0xff] }
 0x582   :  { %v1088_v37 = vmul.f32 %v1721_v34, %v1718_v25  ;;  %vm1071_vm0 = vmor %vm1069_vm15, %vm1070_vm14  ;;  %vm1093_vm2 = vweird.f32 %v1721_v34  ;;  %1243 = vmatpush.msra.mxu2 %v1142_v23  ;;  %v1141_v25 = vld [vmem:[#allocation2 + $0x258] sm:$0xff]  ;;  %1224 = vmatpush.msrb.mxu1 %v1125_v26 }
 0x583   :  { %v1066_v41 = vsub.f32 1.0, %v1065_v35  ;;  %vm1094_vm4 = vmor %vm1092_vm3, %vm1093_vm2 }
 0x584   :  { %v1089_v43 = vsub.f32 1.0, %v1088_v37  ;;  %1244 = vmatpush.msra.mxu2 %v1141_v25  ;;  %v1157_v37 = vld [vmem:[#allocation4 + $0x3] ss:$0 sm:$0xff] }
 0x585   :  { %v1067_v46 = vmul.f32 %v1412_v32, %v1066_v41 }
 0x586   :  { %v1090_v12 = vmul.f32 %v1721_v34, %v1089_v43 }
 0x587   :  { %v1068_v14 = vadd.f32 %v1412_v32, %v1067_v46 }
 0x588   :  { %v1091_v55 = vadd.f32 %v1721_v34, %v1090_v12 }
 0x589   :  { %v1072_v54 = vsel %vm1071_vm0, %v1412_v32, %v1068_v14  ;;  %v1161_v32 = vperm.slane %v1124_v27, 0 }
 0x58a   :  { %v1077_v4 = vsel %vm1074_vm1, %v1076_v16, %v1072_v54  ;;  %v1095_v10 = vsel %vm1094_vm4, %v1721_v34, %v1091_v55 }
 0x58b   :  { %v1106_v6 = vmul.f32 %v1104_v3, %v1077_v4  ;;  %v1100_v63 = vsel %vm1097_vm5, %v1099_v61, %v1095_v10 }
 0x58c   :  { %v1109_v2 = vsub.f32 1.0, %v1100_v63  ;;  %v1113_v13 = vmul.f32 %v1111_v1, %v1100_v63 }
 0x58d   :  { %v1107_v59 = vadd.f32 %v1106_v6, %v1591_v52 }
 0x58f   :  { %1415 = vtanh.f32 %v1107_v59 }
 0x595   :  { %v1416_v52 = vpop.eup %1415 }
 0x596   :  { %v1110_v9 = vmul.f32 %v1416_v52, %v1109_v2 }
 0x598   :  { %v1114_v17 = vadd.f32 %v1113_v13, %v1110_v9 }
 0x59a   :  { %v1159_v18 = vrot.slane %v1114_v17, 7 }
 0x59c   :  { %1330 = vmatmul.msk.f32.vlgmr.msra.gmra.mxu3 %vm143_vm10, %v1159_v18  ;;  %1331 = vmatmul.msk.f32.vlgmr.msra.gmra.mxu0 %vm143_vm10, %v1159_v18  ;;  %vm1251_vm10 = vcmp.lt.s32.totalorder %v1250_v38, 4 }
 0x619   :  { %v1204_v29 = vpop.f32.mrf.mxu0 }
 0x61a   :  { %v1205_v30 = vadd.f32 %v1204_v29, %v1162_v28 }
 0x61c   :  { %v1208_v31 = vmax.f32 %v1205_v30, 0.0 }
 0x61e   :  { %1245 = vmatmul.f32.vlgmr.msra.gmra.mxu2 %v1208_v31 }
 0x61f   :  { %v1184_v33 = vpop.f32.mrf.mxu3 }
 0x620   :  { %v1185_v34 = vadd.f32 %v1184_v33, %v1161_v32 }
 0x622   :  { %v1207_v35 = vmax.f32 %v1185_v34, 0.0 }
 0x624   :  { %1225 = vmatmul.f32.vlgmr.msrb.gmra.mxu1 %v1207_v35 }
 0x6a1   :  { %v1226_v39 = vpop.f32.mrf.mxu1  ;;  %v1246_v42 = vpop.f32.mrf.mxu2 }
 0x6a2   :  { %v1227_v41 = vadd.f32 %v1226_v39, %v1157_v37 }
 0x6a4   :  { %v1247_v43 = vadd.f32 %v1246_v42, %v1227_v41 }
 0x6a6   :  { %v1252_v44 = vsel %vm1251_vm10, %v1247_v43, -1e+30 }
 0x6a7   :  { %v1254_v45 = vsel %vm1253_vm6, %v1252_v44, -inf }
 0x6a8   :  { %1255 = vmax.xlane.f32.xlu0 %v1254_v45 }
 0x71b   :  { %v1256_v46 = vpop.xlane.xlu0 %1255 }
 0x71c   :  { %v1257_v47 = vsub.f32 %v1247_v43, %v1256_v46 }
 0x71e   :  { %v1258_v48 = vmul.f32 1.442695, %v1257_v47 }
 0x720   :  { %1417 = vpow2.f32 %v1258_v48 }
 0x726   :  { %v1418_v49 = vpop.eup %1417 }
 0x727   :  { %v1260_v50 = vsel %vm1251_vm10, %v1418_v49, 0.0 }
 0x728   :  { %v1261_v12 = vsel %vm1253_vm6, %v1260_v50, 0.0 }
 0x729   :  { %1262 = vadd.xlane.f32.xlu0 %v1261_v12 }
 0x79c   :  { %v1263_v51 = vpop.xlane.xlu0 %1262 }
 0x79d   :  { %1419 = vrcp.f32 %v1263_v51  ;;  %v1275_v53 = vand.u32 2147483648, %v1263_v51  ;;  %v1273_v3 = vand.u32 2147483647, %v1263_v51  ;;  %vm1269_vm8 = vweird.f32 %v1263_v51 }
 0x79f   :  { %v1276_v4 = vor.u32 1.1754944e-38, %v1275_v53  ;;  %vm1274_vm11 = vcmp.eq.f32.partialorder %v1273_v3, 8.507059e+37 }
 0x7a3   :  { %v1420_v14 = vpop.eup %1419 }
 0x7a4   :  { %v1265_v15 = vmul.f32 %v1420_v14, %v1263_v51  ;;  %vm1270_vm7 = vweird.f32 %v1420_v14 }
 0x7a5   :  { %vm1271_vm9 = vmor %vm1269_vm8, %vm1270_vm7 }
 0x7a6   :  { %v1266_v16 = vsub.f32 1.0, %v1265_v15 }
 0x7a8   :  { %v1267_v54 = vmul.f32 %v1420_v14, %v1266_v16 }
 0x7aa   :  { %v1268_v40 = vadd.f32 %v1420_v14, %v1267_v54 }
 0x7ac   :  { %v1272_v55 = vsel %vm1271_vm9, %v1420_v14, %v1268_v40 }
 0x7ad   :  { %v1277_v56 = vsel %vm1274_vm11, %v1276_v4, %v1272_v55 }
 0x7ae   :  { %v1278_v5 = vmul.f32 %v1277_v56, %v1260_v50 }
 0x7b0   :  { %v1279_v6 = vsel %vm1251_vm10, %v1278_v5, %v1247_v43 }
 0x7b1   :  { %1280 = vst [vmem:[%s1745_s3] sm:$0x1] %v1279_v6 }
 0x7b2   :  { %1285 = vsyncpa [#allocation3], 1 }
 0x7b3   :  { %1286 = vsyncpa [#allocation5], 1 }

</bundles_post_ra>
